<compile_context>
chip_gen: v5e
topology: v5e:2x2
jax: 0.10.0
libtpu: 0.0.40
codegen_flags: <defaults>
</compile_context>

<pallas_src>
import functools

import jax
import jax.numpy as jnp
from jax.experimental import pallas as pl
from jax.experimental.pallas import tpu as pltpu


LANE = 128                            # lane width: feature dims padded to this
MAX_TILE = 1024                       # max row / K tile for the aggregation kernel
XW_RESIDENT_BYTES = 6 * 1024 * 1024   # keep whole XW VMEM-resident below this


def _round_up(x, m):
    return (x + m - 1) // m * m


def _tiling(num_nodes):
    """Pick (tile, padded_node_count): tile in {1024,512,256}, tile | n_p."""
    n_p = _round_up(num_nodes, 256)
    for tile in (1024, 512, 256):
        if n_p % tile == 0:
            return tile, n_p
    raise AssertionError("unreachable")


# --------------------------------------------------------------------------- #
# Kernel 1: XW = X @ W   (row-tiled; only used for layer 0)
# --------------------------------------------------------------------------- #
def _xw_kernel(x_ref, w_ref, o_ref):
    o_ref[...] = jnp.dot(
        x_ref[...], w_ref[...], preferred_element_type=jnp.float32
    ).astype(o_ref.dtype)


def matmul_xw(x, w, *, tile_n, out_dtype=jnp.bfloat16):
    n, d_in = x.shape
    d_out = w.shape[1]
    assert n % tile_n == 0
    return pl.pallas_call(
        _xw_kernel,
        out_shape=jax.ShapeDtypeStruct((n, d_out), out_dtype),
        grid_spec=pltpu.PrefetchScalarGridSpec(
            num_scalar_prefetch=0,
            grid=(n // tile_n,),
            in_specs=[
                pl.BlockSpec((tile_n, d_in), lambda i: (i, 0)),   # X row tile
                pl.BlockSpec((d_in, d_out), lambda i: (0, 0)),    # full W (small)
            ],
            out_specs=pl.BlockSpec((tile_n, d_out), lambda i: (i, 0)),
        ),
        compiler_params=pltpu.CompilerParams(
            dimension_semantics=("parallel",),
        ),
    )(x, w)


# --------------------------------------------------------------------------- #
# Kernel 2: aggregation  acc = A_hat @ XW  (K-tiled f32 accumulator)
#   epilogue (k == last):
#     * intermediate layer:  o = relu(acc + b) @ W_next        (fused next X@W)
#     * last layer:          o = acc + b
# --------------------------------------------------------------------------- #
def _agg_kernel(*refs, tile_k, xw_resident, fuse_next):
    if fuse_next:
        a_ref, xw_ref, b_ref, wn_ref, o_ref, acc_ref = refs
    else:
        a_ref, xw_ref, b_ref, o_ref, acc_ref = refs
        wn_ref = None

    k = pl.program_id(1)

    @pl.when(k == 0)
    def _():
        acc_ref[...] = jnp.zeros_like(acc_ref)

    if xw_resident:
        # Whole XW lives in VMEM (constant-index BlockSpec); slice the K slab.
        start = pl.multiple_of(k * tile_k, tile_k)
        xw_blk = xw_ref[pl.ds(start, tile_k), :]
    else:
        xw_blk = xw_ref[...]

    acc_ref[...] += jnp.dot(a_ref[...], xw_blk, preferred_element_type=jnp.float32)

    @pl.when(k == pl.num_programs(1) - 1)
    def _():
        out = acc_ref[...] + b_ref[...]           # (1, Dp) bias broadcasts over rows
        if fuse_next:
            h = jnp.maximum(out, 0.0).astype(jnp.bfloat16)
            o_ref[...] = jnp.dot(
                h, wn_ref[...], preferred_element_type=jnp.float32
            ).astype(o_ref.dtype)
        else:
            o_ref[...] = out.astype(o_ref.dtype)


def gcn_propagate(a_hat, xw, b2d, w_next, *, out_dtype, tile_n, tile_k):
    n = a_hat.shape[0]
    d_out = xw.shape[1]
    assert n % tile_n == 0 and n % tile_k == 0

    xw_resident = xw.size * xw.dtype.itemsize <= XW_RESIDENT_BYTES
    fuse_next = w_next is not None
    d_next = w_next.shape[1] if fuse_next else d_out

    if xw_resident:
        # Constant index_map -> DMA'd once, stays resident; kills the per-row-tile
        # K-slab re-reads (~+50% HBM traffic previously).
        xw_spec = pl.BlockSpec((n, d_out), lambda i, k: (0, 0))
    else:
        xw_spec = pl.BlockSpec((tile_k, d_out), lambda i, k: (k, 0))

    in_specs = [
        pl.BlockSpec((tile_n, tile_k), lambda i, k: (i, k)),      # A_hat tile
        xw_spec,                                                  # XW
        pl.BlockSpec((1, d_out), lambda i, k: (0, 0)),            # bias
    ]
    args = [a_hat, xw, b2d]
    if fuse_next:
        in_specs.append(pl.BlockSpec(w_next.shape, lambda i, k: (0, 0)))
        args.append(w_next)

    kernel = functools.partial(
        _agg_kernel, tile_k=tile_k, xw_resident=xw_resident, fuse_next=fuse_next)

    return pl.pallas_call(
        kernel,
        out_shape=jax.ShapeDtypeStruct((n, d_next), out_dtype),
        grid_spec=pltpu.PrefetchScalarGridSpec(
            num_scalar_prefetch=0,
            grid=(n // tile_n, n // tile_k),
            in_specs=in_specs,
            out_specs=pl.BlockSpec((tile_n, d_next), lambda i, k: (i, 0)),
            scratch_shapes=[pltpu.VMEM((tile_n, d_out), jnp.float32)],
        ),
        compiler_params=pltpu.CompilerParams(
            dimension_semantics=("parallel", "arbitrary"),
        ),
    )(*args)


# --------------------------------------------------------------------------- #
# One-time (cached) graph / parameter prep -- mirrors CachedGCNConv caching
# --------------------------------------------------------------------------- #
def build_normalized_adjacency_padded(edge_index, num_nodes, n_padded,
                                      dtype=jnp.bfloat16):
    """Padded bf16 A_hat = D^{-1/2} (A + I) D^{-1/2} (PyG gcn_norm semantics)."""
    src = edge_index[0]
    dst = edge_index[1]
    self_idx = jnp.arange(num_nodes, dtype=edge_index.dtype)
    src = jnp.concatenate([src, self_idx])
    dst = jnp.concatenate([dst, self_idx])
    ones = jnp.ones(src.shape[0], dtype=jnp.float32)

    deg = jnp.zeros((num_nodes,), jnp.float32).at[dst].add(ones)
    deg_inv_sqrt = jnp.where(deg > 0, 1.0 / jnp.sqrt(deg), 0.0)
    norm = deg_inv_sqrt[src] * deg_inv_sqrt[dst]

    # out[dst] += norm * x[src]  =>  A_hat[dst, src] = norm
    a = jnp.zeros((num_nodes, num_nodes), jnp.float32).at[dst, src].add(norm)
    pad = n_padded - num_nodes
    return jnp.pad(a.astype(dtype), ((0, pad), (0, pad)))   # bf16 directly


def init_gnn_params(key, in_dim, hid_dim, num_layers=3, dtype=jnp.float32):
    """Glorot-style init; layer l: weight (d_in, hid_dim), bias (hid_dim,)."""
    params = []
    d_in = in_dim
    for _ in range(num_layers):
        key, wk = jax.random.split(key)
        scale = jnp.sqrt(6.0 / (d_in + hid_dim)).astype(dtype)
        w = jax.random.uniform(wk, (d_in, hid_dim), dtype=dtype,
                               minval=-1.0, maxval=1.0) * scale
        b = jnp.zeros((hid_dim,), dtype=dtype)
        params.append((w, b))
        d_in = hid_dim
    return params


def prepare_params(params, in_dim):
    """Zero-pad weights/biases to lane width and cast weights to bf16 (once)."""
    hid_dim = params[0][0].shape[1]
    in_p = _round_up(in_dim, LANE)
    hid_p = _round_up(hid_dim, LANE)
    padded = []
    d_in_p = in_p
    for w, b in params:
        w_p = jnp.zeros((d_in_p, hid_p), jnp.float32)
        w_p = w_p.at[: w.shape[0], : w.shape[1]].set(w).astype(jnp.bfloat16)
        b_p = jnp.zeros((1, hid_p), jnp.float32).at[0, : b.shape[0]].set(b)
        padded.append((w_p, b_p))
        d_in_p = hid_p
    return tuple(padded)


# --------------------------------------------------------------------------- #
# Full GNN forward (3 CachedGCNConv layers, ReLU between layers)
# --------------------------------------------------------------------------- #
@functools.partial(jax.jit, static_argnames=("hid_dim",))
def gnn_forward(x, a_hat_p, padded_params, *, hid_dim):
    """Equivalent of GNN.forward(x, edge_index, cache_name) with gnn_type='gcn'.

    x:            [num_nodes, in_dim] float32
    a_hat_p:      [n_p, n_p] bf16 padded normalized adjacency (cached)
    padded_params: tuple of (W_p bf16, b_p f32) per layer (cached)
    returns:      [num_nodes, hid_dim] float32
    """
    n, in_dim = x.shape
    tile, n_p = _tiling(n)
    assert a_hat_p.shape[0] == n_p
    in_p = padded_params[0][0].shape[0]
    num_layers = len(padded_params)

    # Zero-padded bf16 features.
    h0 = jnp.pad(x, ((0, n_p - n), (0, in_p - in_dim))).astype(jnp.bfloat16)

    # Layer-0 X @ W (subsequent layers' X@W are fused into the agg epilogue).
    xw = matmul_xw(h0, padded_params[0][0], tile_n=tile)

    out = None
    for i in range(num_layers):
        is_last = i == num_layers - 1
        b_i = padded_params[i][1]
        w_next = None if is_last else padded_params[i + 1][0]
        out = gcn_propagate(
            a_hat_p, xw, b_i, w_next,
            out_dtype=jnp.float32 if is_last else jnp.bfloat16,
            tile_n=tile, tile_k=tile,
        )
        if not is_last:
            xw = out   # already the next layer's X @ W (fused epilogue)
        # TODO(synk): nn.Dropout(0.1) between layers is stochastic; modeled as
        # eval-mode identity here (no scaling, no masking).

    return out[:n, :hid_dim]


if __name__ == "__main__":
    key = jax.random.PRNGKey(0)

    num_nodes = 256
    num_edges = 1024
    in_dim = 16
    hid_dim = 32

    k_x, k_e0, k_e1, k_p = jax.random.split(key, 4)
    x = jax.random.normal(k_x, (num_nodes, in_dim), dtype=jnp.float32)
    src = jax.random.randint(k_e0, (num_edges,), 0, num_nodes, dtype=jnp.int32)
    dst = jax.random.randint(k_e1, (num_edges,), 0, num_nodes, dtype=jnp.int32)
    edge_index = jnp.stack([src, dst], axis=0)

    params = init_gnn_params(k_p, in_dim, hid_dim, num_layers=3)

    # One-time prep (cached across calls, mirroring CachedGCNConv's cache_name).
    _, n_p = _tiling(num_nodes)
    a_hat_p = build_normalized_adjacency_padded(edge_index, num_nodes, n_p)
    padded_params = prepare_params(params, in_dim)

    out = gnn_forward(x, a_hat_p, padded_params, hid_dim=hid_dim)
    out = jax.block_until_ready(out)

    assert out.shape == (num_nodes, hid_dim)
    assert bool(jnp.all(jnp.isfinite(out)))
    print("KERNEL_OK")
</pallas_src>

<mosaic_0001>
module attributes {stable_mosaic.version = 11 : i64} {
  func.func @_xw_kernel(%arg0: i32, %arg1: memref<256x128xbf16, #tpu.memory_space<vmem>>, %arg2: memref<128x128xbf16, #tpu.memory_space<vmem>>, %arg3: memref<256x128xbf16, #tpu.memory_space<vmem>>) attributes {dimension_semantics = [#tpu.dimension_semantics<parallel>], iteration_bounds = array<i64: 1>, scalar_prefetch = 0 : i64, scratch_operands = 0 : i64, tpu.core_type = #tpu.core_type<tc>, window_params = [{transform_indices = @transform_0, window_bounds = array<i64: 256, 128>}, {pipeline_mode = #tpu.pipeline_mode<synchronous>, transform_indices = @transform_1, window_bounds = array<i64: 128, 128>}, {transform_indices = @transform_2, window_bounds = array<i64: 256, 128>}]} {
    %c0 = arith.constant 0 : index
    %c0_0 = arith.constant 0 : index
    %0 = vector.load %arg1[%c0, %c0_0] : memref<256x128xbf16, #tpu.memory_space<vmem>>, vector<256x128xbf16>
    %c0_1 = arith.constant 0 : index
    %c0_2 = arith.constant 0 : index
    %1 = vector.load %arg2[%c0_1, %c0_2] : memref<128x128xbf16, #tpu.memory_space<vmem>>, vector<128x128xbf16>
    %cst = arith.constant dense<0.000000e+00> : vector<256x128xf32>
    %2 = tpu.matmul %0, %1, %cst {dimension_numbers = #tpu.dot_dimension_numbers<[1], [0], [0], [1], [0, 0, 1, 1], [], []>} : vector<256x128xbf16>, vector<128x128xbf16>, vector<256x128xf32> -> vector<256x128xf32>
    %3 = arith.truncf %2 : vector<256x128xf32> to vector<256x128xbf16>
    %c0_3 = arith.constant 0 : index
    %c0_4 = arith.constant 0 : index
    %4 = vector.load %arg3[%c0_3, %c0_4] : memref<256x128xbf16, #tpu.memory_space<vmem>>, vector<256x128xbf16>
    tpu.vector_store %arg3[%c0_3, %c0_4], %3 {strides = array<i32>} : memref<256x128xbf16, #tpu.memory_space<vmem>>, vector<256x128xbf16>,
    return
  }
  func.func @transform_0(%arg0: i32) -> (i32, i32) {
    %c0_i32 = arith.constant 0 : i32
    %c0_i32_0 = arith.constant 0 : i32
    return %arg0, %c0_i32 : i32, i32
  }
  func.func @transform_1(%arg0: i32) -> (i32, i32) {
    %c0_i32 = arith.constant 0 : i32
    %c0_i32_0 = arith.constant 0 : i32
    %c0_i32_1 = arith.constant 0 : i32
    return %c0_i32, %c0_i32_0 : i32, i32
  }
  func.func @transform_2(%arg0: i32) -> (i32, i32) {
    %c0_i32 = arith.constant 0 : i32
    %c0_i32_0 = arith.constant 0 : i32
    return %arg0, %c0_i32 : i32, i32
  }
}

module attributes {stable_mosaic.version = 11 : i64} {
  func.func @_agg_kernel(%arg0: i32, %arg1: i32, %arg2: memref<256x256xbf16, #tpu.memory_space<vmem>>, %arg3: memref<256x128xbf16, #tpu.memory_space<vmem>>, %arg4: memref<1x128xf32, #tpu.memory_space<vmem>>, %arg5: memref<128x128xbf16, #tpu.memory_space<vmem>>, %arg6: memref<256x128xbf16, #tpu.memory_space<vmem>>, %arg7: memref<256x128xf32, #tpu.memory_space<vmem>>) attributes {dimension_semantics = [#tpu.dimension_semantics<parallel>, #tpu.dimension_semantics<arbitrary>], iteration_bounds = array<i64: 1, 1>, scalar_prefetch = 0 : i64, scratch_operands = 1 : i64, tpu.core_type = #tpu.core_type<tc>, window_params = [{transform_indices = @transform_0, window_bounds = array<i64: 256, 256>}, {pipeline_mode = #tpu.pipeline_mode<synchronous>, transform_indices = @transform_1, window_bounds = array<i64: 256, 128>}, {pipeline_mode = #tpu.pipeline_mode<synchronous>, transform_indices = @transform_2, window_bounds = array<i64: 1, 128>}, {pipeline_mode = #tpu.pipeline_mode<synchronous>, transform_indices = @transform_3, window_bounds = array<i64: 128, 128>}, {transform_indices = @transform_4, window_bounds = array<i64: 256, 128>}]} {
    %c0_i32 = arith.constant 0 : i32
    %0 = arith.cmpi eq, %arg1, %c0_i32 : i32
    %1 = arith.extui %0 : i1 to i32
    %c0_i32_0 = arith.constant 0 : i32
    %2 = arith.cmpi ne, %1, %c0_i32_0 : i32
    scf.if %2 {
      %cst_9 = arith.constant 0.000000e+00 : f32
      %15 = vector.broadcast %cst_9 : f32 to vector<256x128xf32>
      %c0_10 = arith.constant 0 : index
      %c0_11 = arith.constant 0 : index
      %16 = vector.load %arg7[%c0_10, %c0_11] : memref<256x128xf32, #tpu.memory_space<vmem>>, vector<256x128xf32>
      tpu.vector_store %arg7[%c0_10, %c0_11], %15 {strides = array<i32>} : memref<256x128xf32, #tpu.memory_space<vmem>>, vector<256x128xf32>,
    } else {
    }
    %c256_i32 = arith.constant 256 : i32
    %3 = arith.muli %arg1, %c256_i32 : i32
    %4 = tpu.assume_multiple %3, 256 : i32
    %5 = arith.index_cast %4 : i32 to index
    %c0 = arith.constant 0 : index
    %6 = vector.load %arg3[%5, %c0] : memref<256x128xbf16, #tpu.memory_space<vmem>>, vector<256x128xbf16>
    %c0_1 = arith.constant 0 : index
    %c0_2 = arith.constant 0 : index
    %7 = vector.load %arg7[%c0_1, %c0_2] : memref<256x128xf32, #tpu.memory_space<vmem>>, vector<256x128xf32>
    %c0_3 = arith.constant 0 : index
    %c0_4 = arith.constant 0 : index
    %8 = vector.load %arg2[%c0_3, %c0_4] : memref<256x256xbf16, #tpu.memory_space<vmem>>, vector<256x256xbf16>
    %cst = arith.constant dense<0.000000e+00> : vector<256x128xf32>
    %9 = tpu.matmul %8, %6, %cst {dimension_numbers = #tpu.dot_dimension_numbers<[1], [0], [0], [1], [0, 0, 1, 1], [], []>} : vector<256x256xbf16>, vector<256x128xbf16>, vector<256x128xf32> -> vector<256x128xf32>
    %10 = arith.addf %7, %9 : vector<256x128xf32>
    %c0_5 = arith.constant 0 : index
    %c0_6 = arith.constant 0 : index
    %11 = vector.load %arg7[%c0_5, %c0_6] : memref<256x128xf32, #tpu.memory_space<vmem>>, vector<256x128xf32>
    tpu.vector_store %arg7[%c0_5, %c0_6], %10 {strides = array<i32>} : memref<256x128xf32, #tpu.memory_space<vmem>>, vector<256x128xf32>,
    %c0_i32_7 = arith.constant 0 : i32
    %12 = arith.cmpi eq, %arg1, %c0_i32_7 : i32
    %13 = arith.extui %12 : i1 to i32
    %c0_i32_8 = arith.constant 0 : i32
    %14 = arith.cmpi ne, %13, %c0_i32_8 : i32
    scf.if %14 {
      %c0_9 = arith.constant 0 : index
      %c0_10 = arith.constant 0 : index
      %15 = vector.load %arg7[%c0_9, %c0_10] : memref<256x128xf32, #tpu.memory_space<vmem>>, vector<256x128xf32>
      %c0_11 = arith.constant 0 : index
      %c0_12 = arith.constant 0 : index
      %16 = vector.load %arg4[%c0_11, %c0_12] : memref<1x128xf32, #tpu.memory_space<vmem>>, vector<1x128xf32>
      %17 = vector.broadcast %16 : vector<1x128xf32> to vector<256x128xf32>
      %18 = arith.addf %15, %17 : vector<256x128xf32>
      %cst_13 = arith.constant 0.000000e+00 : f32
      %19 = vector.broadcast %cst_13 : f32 to vector<256x128xf32>
      %20 = arith.maximumf %18, %19 : vector<256x128xf32>
      %21 = arith.truncf %20 : vector<256x128xf32> to vector<256x128xbf16>
      %c0_14 = arith.constant 0 : index
      %c0_15 = arith.constant 0 : index
      %22 = vector.load %arg5[%c0_14, %c0_15] : memref<128x128xbf16, #tpu.memory_space<vmem>>, vector<128x128xbf16>
      %cst_16 = arith.constant dense<0.000000e+00> : vector<256x128xf32>
      %23 = tpu.matmul %21, %22, %cst_16 {dimension_numbers = #tpu.dot_dimension_numbers<[1], [0], [0], [1], [0, 0, 1, 1], [], []>} : vector<256x128xbf16>, vector<128x128xbf16>, vector<256x128xf32> -> vector<256x128xf32>
      %24 = arith.truncf %23 : vector<256x128xf32> to vector<256x128xbf16>
      %c0_17 = arith.constant 0 : index
      %c0_18 = arith.constant 0 : index
      %25 = vector.load %arg6[%c0_17, %c0_18] : memref<256x128xbf16, #tpu.memory_space<vmem>>, vector<256x128xbf16>
      tpu.vector_store %arg6[%c0_17, %c0_18], %24 {strides = array<i32>} : memref<256x128xbf16, #tpu.memory_space<vmem>>, vector<256x128xbf16>,
    } else {
    }
    return
  }
  func.func @transform_0(%arg0: i32, %arg1: i32) -> (i32, i32) {
    %c0_i32 = arith.constant 0 : i32
    return %arg0, %arg1 : i32, i32
  }
  func.func @transform_1(%arg0: i32, %arg1: i32) -> (i32, i32) {
    %c0_i32 = arith.constant 0 : i32
    %c0_i32_0 = arith.constant 0 : i32
    %c0_i32_1 = arith.constant 0 : i32
    return %c0_i32, %c0_i32_0 : i32, i32
  }
  func.func @transform_2(%arg0: i32, %arg1: i32) -> (i32, i32) {
    %c0_i32 = arith.constant 0 : i32
    %c0_i32_0 = arith.constant 0 : i32
    %c0_i32_1 = arith.constant 0 : i32
    return %c0_i32, %c0_i32_0 : i32, i32
  }
  func.func @transform_3(%arg0: i32, %arg1: i32) -> (i32, i32) {
    %c0_i32 = arith.constant 0 : i32
    %c0_i32_0 = arith.constant 0 : i32
    %c0_i32_1 = arith.constant 0 : i32
    return %c0_i32, %c0_i32_0 : i32, i32
  }
  func.func @transform_4(%arg0: i32, %arg1: i32) -> (i32, i32) {
    %c0_i32 = arith.constant 0 : i32
    %c0_i32_0 = arith.constant 0 : i32
    return %arg0, %c0_i32 : i32, i32
  }
}

module attributes {stable_mosaic.version = 11 : i64} {
  func.func @_agg_kernel(%arg0: i32, %arg1: i32, %arg2: memref<256x256xbf16, #tpu.memory_space<vmem>>, %arg3: memref<256x128xbf16, #tpu.memory_space<vmem>>, %arg4: memref<1x128xf32, #tpu.memory_space<vmem>>, %arg5: memref<256x128xf32, #tpu.memory_space<vmem>>, %arg6: memref<256x128xf32, #tpu.memory_space<vmem>>) attributes {dimension_semantics = [#tpu.dimension_semantics<parallel>, #tpu.dimension_semantics<arbitrary>], iteration_bounds = array<i64: 1, 1>, scalar_prefetch = 0 : i64, scratch_operands = 1 : i64, tpu.core_type = #tpu.core_type<tc>, window_params = [{transform_indices = @transform_0, window_bounds = array<i64: 256, 256>}, {pipeline_mode = #tpu.pipeline_mode<synchronous>, transform_indices = @transform_1, window_bounds = array<i64: 256, 128>}, {pipeline_mode = #tpu.pipeline_mode<synchronous>, transform_indices = @transform_2, window_bounds = array<i64: 1, 128>}, {transform_indices = @transform_3, window_bounds = array<i64: 256, 128>}]} {
    %c0_i32 = arith.constant 0 : i32
    %0 = arith.cmpi eq, %arg1, %c0_i32 : i32
    %1 = arith.extui %0 : i1 to i32
    %c0_i32_0 = arith.constant 0 : i32
    %2 = arith.cmpi ne, %1, %c0_i32_0 : i32
    scf.if %2 {
      %cst_9 = arith.constant 0.000000e+00 : f32
      %15 = vector.broadcast %cst_9 : f32 to vector<256x128xf32>
      %c0_10 = arith.constant 0 : index
      %c0_11 = arith.constant 0 : index
      %16 = vector.load %arg6[%c0_10, %c0_11] : memref<256x128xf32, #tpu.memory_space<vmem>>, vector<256x128xf32>
      tpu.vector_store %arg6[%c0_10, %c0_11], %15 {strides = array<i32>} : memref<256x128xf32, #tpu.memory_space<vmem>>, vector<256x128xf32>,
    } else {
    }
    %c256_i32 = arith.constant 256 : i32
    %3 = arith.muli %arg1, %c256_i32 : i32
    %4 = tpu.assume_multiple %3, 256 : i32
    %5 = arith.index_cast %4 : i32 to index
    %c0 = arith.constant 0 : index
    %6 = vector.load %arg3[%5, %c0] : memref<256x128xbf16, #tpu.memory_space<vmem>>, vector<256x128xbf16>
    %c0_1 = arith.constant 0 : index
    %c0_2 = arith.constant 0 : index
    %7 = vector.load %arg6[%c0_1, %c0_2] : memref<256x128xf32, #tpu.memory_space<vmem>>, vector<256x128xf32>
    %c0_3 = arith.constant 0 : index
    %c0_4 = arith.constant 0 : index
    %8 = vector.load %arg2[%c0_3, %c0_4] : memref<256x256xbf16, #tpu.memory_space<vmem>>, vector<256x256xbf16>
    %cst = arith.constant dense<0.000000e+00> : vector<256x128xf32>
    %9 = tpu.matmul %8, %6, %cst {dimension_numbers = #tpu.dot_dimension_numbers<[1], [0], [0], [1], [0, 0, 1, 1], [], []>} : vector<256x256xbf16>, vector<256x128xbf16>, vector<256x128xf32> -> vector<256x128xf32>
    %10 = arith.addf %7, %9 : vector<256x128xf32>
    %c0_5 = arith.constant 0 : index
    %c0_6 = arith.constant 0 : index
    %11 = vector.load %arg6[%c0_5, %c0_6] : memref<256x128xf32, #tpu.memory_space<vmem>>, vector<256x128xf32>
    tpu.vector_store %arg6[%c0_5, %c0_6], %10 {strides = array<i32>} : memref<256x128xf32, #tpu.memory_space<vmem>>, vector<256x128xf32>,
    %c0_i32_7 = arith.constant 0 : i32
    %12 = arith.cmpi eq, %arg1, %c0_i32_7 : i32
    %13 = arith.extui %12 : i1 to i32
    %c0_i32_8 = arith.constant 0 : i32
    %14 = arith.cmpi ne, %13, %c0_i32_8 : i32
    scf.if %14 {
      %c0_9 = arith.constant 0 : index
      %c0_10 = arith.constant 0 : index
      %15 = vector.load %arg6[%c0_9, %c0_10] : memref<256x128xf32, #tpu.memory_space<vmem>>, vector<256x128xf32>
      %c0_11 = arith.constant 0 : index
      %c0_12 = arith.constant 0 : index
      %16 = vector.load %arg4[%c0_11, %c0_12] : memref<1x128xf32, #tpu.memory_space<vmem>>, vector<1x128xf32>
      %17 = vector.broadcast %16 : vector<1x128xf32> to vector<256x128xf32>
      %18 = arith.addf %15, %17 : vector<256x128xf32>
      %c0_13 = arith.constant 0 : index
      %c0_14 = arith.constant 0 : index
      %19 = vector.load %arg5[%c0_13, %c0_14] : memref<256x128xf32, #tpu.memory_space<vmem>>, vector<256x128xf32>
      tpu.vector_store %arg5[%c0_13, %c0_14], %18 {strides = array<i32>} : memref<256x128xf32, #tpu.memory_space<vmem>>, vector<256x128xf32>,
    } else {
    }
    return
  }
  func.func @transform_0(%arg0: i32, %arg1: i32) -> (i32, i32) {
    %c0_i32 = arith.constant 0 : i32
    return %arg0, %arg1 : i32, i32
  }
  func.func @transform_1(%arg0: i32, %arg1: i32) -> (i32, i32) {
    %c0_i32 = arith.constant 0 : i32
    %c0_i32_0 = arith.constant 0 : i32
    %c0_i32_1 = arith.constant 0 : i32
    return %c0_i32, %c0_i32_0 : i32, i32
  }
  func.func @transform_2(%arg0: i32, %arg1: i32) -> (i32, i32) {
    %c0_i32 = arith.constant 0 : i32
    %c0_i32_0 = arith.constant 0 : i32
    %c0_i32_1 = arith.constant 0 : i32
    return %c0_i32, %c0_i32_0 : i32, i32
  }
  func.func @transform_3(%arg0: i32, %arg1: i32) -> (i32, i32) {
    %c0_i32 = arith.constant 0 : i32
    %c0_i32_0 = arith.constant 0 : i32
    return %arg0, %c0_i32 : i32, i32
  }
}

</mosaic_0001>

<bundles_post_ra>
// kernel: gnn_forward.4
= control target key start
LH: loop header
LB: loop body
LE: loop exit
PB: predicated region body
PF: predicated region fallthrough
CT: control target
= control target key end

     0   :  { %s734_s1 = inlined_call_operand.vmem [shape: bf16[128,128], index: 1, kind: input, shape index: {}]   ;;  %s735_s0 = inlined_call_operand.vmem [shape: bf16[256,128], index: 0, kind: input, shape index: {}]   ;;  %s736_s2 = inlined_call_operand.vmem [shape: bf16[256,128], index: 2, kind: output, shape index: {}]  }
   0x1   :  { %v479_v0 = vld [vmem:[%s734_s1 + $0x38] sm:$0xff]  ;;  %v478_v1 = vld [vmem:[%s734_s1 + $0x30] sm:$0xff]  ;;  %v477_v2 = vld [vmem:[%s734_s1 + $0x28] sm:$0xff] }
   0x2   :  { %203 = vmatpush.bf16.msra.mxu0 %v479_v0  ;;  %575 = vmatpush.bf16.msra.mxu1 %v479_v0  ;;  %v476_v3 = vld [vmem:[%s734_s1 + $0x20] sm:$0xff]  ;;  %v475_v4 = vld [vmem:[%s734_s1 + $0x18] sm:$0xff]  ;;  %v474_v5 = vld [vmem:[%s734_s1 + $0x10] sm:$0xff] }
   0x3   :  { %576 = vmatpush.bf16.msra.mxu2 %v479_v0  ;;  %577 = vmatpush.bf16.msra.mxu3 %v479_v0  ;;  %v473_v6 = vld [vmem:[%s734_s1 + $0x8] sm:$0xff]  ;;  %v472_v7 = vld [vmem:[%s734_s1] sm:$0xff]  ;;  %v458_v16 = vld [vmem:[%s735_s0 + $0x10] sm:$0xff] }
   0x4   :  { %v456_v8 = vld [vmem:[%s735_s0] sm:$0xff]  ;;  %v457_v12 = vld [vmem:[%s735_s0 + $0x8] sm:$0xff]  ;;  %v462_v17 = vld [vmem:[%s735_s0 + $0x30] sm:$0xff] }
   0x5   :  { %v460_v9 = vld [vmem:[%s735_s0 + $0x20] sm:$0xff]  ;;  %v461_v13 = vld [vmem:[%s735_s0 + $0x28] sm:$0xff]  ;;  %v466_v18 = vld [vmem:[%s735_s0 + $0x50] sm:$0xff] }
   0x6   :  { %204 = vmatpush.bf16.msra.mxu0 %v478_v1  ;;  %578 = vmatpush.bf16.msra.mxu1 %v478_v1  ;;  %v464_v10 = vld [vmem:[%s735_s0 + $0x40] sm:$0xff]  ;;  %v465_v14 = vld [vmem:[%s735_s0 + $0x48] sm:$0xff]  ;;  %v470_v19 = vld [vmem:[%s735_s0 + $0x70] sm:$0xff] }
   0x7   :  { %579 = vmatpush.bf16.msra.mxu2 %v478_v1  ;;  %580 = vmatpush.bf16.msra.mxu3 %v478_v1  ;;  %v468_v11 = vld [vmem:[%s735_s0 + $0x60] sm:$0xff]  ;;  %v469_v15 = vld [vmem:[%s735_s0 + $0x68] sm:$0xff]  ;;  %v459_v20 = vld [vmem:[%s735_s0 + $0x18] sm:$0xff] }
   0x8   :  { %v463_v21 = vld [vmem:[%s735_s0 + $0x38] sm:$0xff] }
   0x9   :  { %v467_v22 = vld [vmem:[%s735_s0 + $0x58] sm:$0xff] }
   0xa   :  { %205 = vmatpush.bf16.msra.mxu0 %v477_v2  ;;  %581 = vmatpush.bf16.msra.mxu1 %v477_v2  ;;  %v471_v23 = vld [vmem:[%s735_s0 + $0x78] sm:$0xff] }
   0xb   :  { %582 = vmatpush.bf16.msra.mxu2 %v477_v2  ;;  %583 = vmatpush.bf16.msra.mxu3 %v477_v2 }
   0xe   :  { %206 = vmatpush.bf16.msra.mxu0 %v476_v3  ;;  %584 = vmatpush.bf16.msra.mxu1 %v476_v3 }
   0xf   :  { %585 = vmatpush.bf16.msra.mxu2 %v476_v3  ;;  %586 = vmatpush.bf16.msra.mxu3 %v476_v3 }
  0x12   :  { %207 = vmatpush.bf16.msra.mxu0 %v475_v4  ;;  %587 = vmatpush.bf16.msra.mxu1 %v475_v4 }
  0x13   :  { %588 = vmatpush.bf16.msra.mxu2 %v475_v4  ;;  %589 = vmatpush.bf16.msra.mxu3 %v475_v4 }
  0x16   :  { %208 = vmatpush.bf16.msra.mxu0 %v474_v5  ;;  %590 = vmatpush.bf16.msra.mxu1 %v474_v5 }
  0x17   :  { %591 = vmatpush.bf16.msra.mxu2 %v474_v5  ;;  %592 = vmatpush.bf16.msra.mxu3 %v474_v5 }
  0x1a   :  { %209 = vmatpush.bf16.msra.mxu0 %v473_v6  ;;  %593 = vmatpush.bf16.msra.mxu1 %v473_v6 }
  0x1b   :  { %594 = vmatpush.bf16.msra.mxu2 %v473_v6  ;;  %595 = vmatpush.bf16.msra.mxu3 %v473_v6 }
  0x1e   :  { %210 = vmatpush.bf16.msra.mxu0 %v472_v7  ;;  %596 = vmatpush.bf16.msra.mxu1 %v472_v7 }
  0x1f   :  { %597 = vmatpush.bf16.msra.mxu2 %v472_v7  ;;  %598 = vmatpush.bf16.msra.mxu3 %v472_v7 }
  0x21   :  { %211 = vmatmul.bf16.vlgmr.msra.gmra.mxu0 %v456_v8  ;;  %231 = vmatmul.bf16.vlgmr.msra.gmra.mxu1 %v460_v9 }
  0x22   :  { %251 = vmatmul.bf16.vlgmr.msra.gmra.mxu2 %v464_v10  ;;  %271 = vmatmul.bf16.vlgmr.msra.gmra.mxu3 %v468_v11 }
  0x31   :  { %216 = vmatmul.bf16.gmra.mxu0 %v457_v12  ;;  %236 = vmatmul.bf16.gmra.mxu1 %v461_v13 }
  0x32   :  { %256 = vmatmul.bf16.gmra.mxu2 %v465_v14  ;;  %276 = vmatmul.bf16.gmra.mxu3 %v469_v15 }
  0x41   :  { %221 = vmatmul.bf16.gmra.mxu0 %v458_v16  ;;  %241 = vmatmul.bf16.gmra.mxu1 %v462_v17 }
  0x42   :  { %261 = vmatmul.bf16.gmra.mxu2 %v466_v18  ;;  %281 = vmatmul.bf16.gmra.mxu3 %v470_v19 }
  0x51   :  { %226 = vmatmul.bf16.gmra.mxu0 %v459_v20  ;;  %246 = vmatmul.bf16.gmra.mxu1 %v463_v21 }
  0x52   :  { %266 = vmatmul.bf16.gmra.mxu2 %v467_v22  ;;  %286 = vmatmul.bf16.gmra.mxu3 %v471_v23 }
  0x9e   :  { %v212_v24 = vpop.f32.mrf.mxu0  ;;  %v232_v25 = vpop.f32.mrf.mxu1 }
  0xa5   :  { %v252_v26 = vpop.f32.mrf.mxu2  ;;  %v272_v27 = vpop.f32.mrf.mxu3 }
  0xa6   :  { %v214_v28 = vpop.f32.mrf.mxu0  ;;  %v234_v29 = vpop.f32.mrf.mxu1 }
  0xa7   :  { %v483_v30 = vpack.c.bf16 %v214_v28, %v212_v24  ;;  %v503_v31 = vpack.c.bf16 %v234_v29, %v232_v25 }
  0xa9   :  { %484 = vst [vmem:[%s736_s2] sm:$0xff] %v483_v30  }
  0xaa   :  { %563 = vst [vmem:[%s736_s2 + $0x20] sm:$0xff] %v503_v31  }
  0xad   :  { %v254_v32 = vpop.f32.mrf.mxu2  ;;  %v274_v33 = vpop.f32.mrf.mxu3 }
  0xae   :  { %v523_v34 = vpack.c.bf16 %v254_v32, %v252_v26  ;;  %v543_v35 = vpack.c.bf16 %v274_v33, %v272_v27  ;;  %v217_v36 = vpop.f32.mrf.mxu0  ;;  %v237_v37 = vpop.f32.mrf.mxu1 }
  0xb0   :  { %567 = vst [vmem:[%s736_s2 + $0x40] sm:$0xff] %v523_v34  }
  0xb1   :  { %571 = vst [vmem:[%s736_s2 + $0x60] sm:$0xff] %v543_v35  }
  0xb5   :  { %v257_v38 = vpop.f32.mrf.mxu2  ;;  %v277_v39 = vpop.f32.mrf.mxu3 }
  0xb6   :  { %v219_v40 = vpop.f32.mrf.mxu0  ;;  %v239_v41 = vpop.f32.mrf.mxu1 }
  0xb7   :  { %v488_v42 = vpack.c.bf16 %v219_v40, %v217_v36  ;;  %v508_v43 = vpack.c.bf16 %v239_v41, %v237_v37 }
  0xb9   :  { %560 = vst [vmem:[%s736_s2 + $0x8] sm:$0xff] %v488_v42  }
  0xba   :  { %564 = vst [vmem:[%s736_s2 + $0x28] sm:$0xff] %v508_v43  }
  0xbd   :  { %v259_v44 = vpop.f32.mrf.mxu2  ;;  %v279_v45 = vpop.f32.mrf.mxu3 }
  0xbe   :  { %v528_v46 = vpack.c.bf16 %v259_v44, %v257_v38  ;;  %v548_v47 = vpack.c.bf16 %v279_v45, %v277_v39  ;;  %v222_v48 = vpop.f32.mrf.mxu0  ;;  %v242_v49 = vpop.f32.mrf.mxu1 }
  0xc0   :  { %568 = vst [vmem:[%s736_s2 + $0x48] sm:$0xff] %v528_v46  }
  0xc1   :  { %572 = vst [vmem:[%s736_s2 + $0x68] sm:$0xff] %v548_v47  }
  0xc5   :  { %v262_v50 = vpop.f32.mrf.mxu2  ;;  %v282_v51 = vpop.f32.mrf.mxu3 }
  0xc6   :  { %v224_v52 = vpop.f32.mrf.mxu0  ;;  %v244_v53 = vpop.f32.mrf.mxu1 }
  0xc7   :  { %v493_v54 = vpack.c.bf16 %v224_v52, %v222_v48  ;;  %v513_v55 = vpack.c.bf16 %v244_v53, %v242_v49 }
  0xc9   :  { %561 = vst [vmem:[%s736_s2 + $0x10] sm:$0xff] %v493_v54  }
  0xca   :  { %565 = vst [vmem:[%s736_s2 + $0x30] sm:$0xff] %v513_v55  }
  0xcd   :  { %v264_v56 = vpop.f32.mrf.mxu2  ;;  %v284_v57 = vpop.f32.mrf.mxu3 }
  0xce   :  { %v533_v58 = vpack.c.bf16 %v264_v56, %v262_v50  ;;  %v553_v59 = vpack.c.bf16 %v284_v57, %v282_v51  ;;  %v227_v60 = vpop.f32.mrf.mxu0  ;;  %v247_v61 = vpop.f32.mrf.mxu1 }
  0xd0   :  { %569 = vst [vmem:[%s736_s2 + $0x50] sm:$0xff] %v533_v58  }
  0xd1   :  { %573 = vst [vmem:[%s736_s2 + $0x70] sm:$0xff] %v553_v59  }
  0xd5   :  { %v267_v62 = vpop.f32.mrf.mxu2  ;;  %v287_v63 = vpop.f32.mrf.mxu3 }
  0xd6   :  { %v229_v0 = vpop.f32.mrf.mxu0  ;;  %v249_v1 = vpop.f32.mrf.mxu1 }
  0xd7   :  { %v498_v2 = vpack.c.bf16 %v229_v0, %v227_v60  ;;  %v518_v3 = vpack.c.bf16 %v249_v1, %v247_v61 }
  0xd9   :  { %562 = vst [vmem:[%s736_s2 + $0x18] sm:$0xff] %v498_v2  }
  0xda   :  { %566 = vst [vmem:[%s736_s2 + $0x38] sm:$0xff] %v518_v3  }
  0xdd   :  { %v269_v4 = vpop.f32.mrf.mxu2  ;;  %v289_v5 = vpop.f32.mrf.mxu3 }
  0xde   :  { %v538_v6 = vpack.c.bf16 %v269_v4, %v267_v62  ;;  %v558_v7 = vpack.c.bf16 %v289_v5, %v287_v63 }
  0xe0   :  { %570 = vst [vmem:[%s736_s2 + $0x58] sm:$0xff] %v538_v6  }
  0xe1   :  { %574 = vst [vmem:[%s736_s2 + $0x78] sm:$0xff] %v558_v7  }

// kernel: gnn_forward.7
= control target key start
LH: loop header
LB: loop body
LE: loop exit
PB: predicated region body
PF: predicated region fallthrough
CT: control target
= control target key end

     0   :  { %s1408_s1 = inlined_call_operand.vmem [shape: bf16[256,128], index: 1, kind: input, shape index: {}]   ;;  %s1409_s0 = inlined_call_operand.vmem [shape: bf16[256,256], index: 0, kind: input, shape index: {}]   ;;  %s1410_s2 = inlined_call_operand.vmem [shape: f32[1,128], index: 2, kind: input, shape index: {}]   ;;  %s1411_s3 = inlined_call_operand.vmem [shape: f32[256,128], index: 3, kind: output, shape index: {}]  }
   0x1   :  { %v957_v0 = vld [vmem:[%s1408_s1 + $0x38] sm:$0xff]  ;;  %v956_v2 = vld [vmem:[%s1408_s1 + $0x30] sm:$0xff]  ;;  %v955_v4 = vld [vmem:[%s1408_s1 + $0x28] sm:$0xff] }
   0x2   :  { %v965_v1 = vld [vmem:[%s1408_s1 + $0x78] sm:$0xff]  ;;  %407 = vmatpush.bf16.msra.mxu0 %v957_v0  ;;  %998 = vmatpush.bf16.msra.mxu2 %v957_v0  ;;  %v964_v3 = vld [vmem:[%s1408_s1 + $0x70] sm:$0xff]  ;;  %v963_v5 = vld [vmem:[%s1408_s1 + $0x68] sm:$0xff] }
   0x3   :  { %496 = vmatpush.bf16.msra.mxu1 %v965_v1  ;;  %1006 = vmatpush.bf16.msra.mxu3 %v965_v1  ;;  %v954_v6 = vld [vmem:[%s1408_s1 + $0x20] sm:$0xff]  ;;  %v953_v8 = vld [vmem:[%s1408_s1 + $0x18] sm:$0xff]  ;;  %v952_v10 = vld [vmem:[%s1408_s1 + $0x10] sm:$0xff] }
   0x4   :  { %v962_v7 = vld [vmem:[%s1408_s1 + $0x60] sm:$0xff]  ;;  %v961_v9 = vld [vmem:[%s1408_s1 + $0x58] sm:$0xff]  ;;  %v960_v11 = vld [vmem:[%s1408_s1 + $0x50] sm:$0xff] }
   0x5   :  { %v951_v12 = vld [vmem:[%s1408_s1 + $0x8] sm:$0xff]  ;;  %v950_v14 = vld [vmem:[%s1408_s1] sm:$0xff]  ;;  %v768_v28 = vld [vmem:[%s1409_s0 + $0x10] sm:$0xf] }
   0x6   :  { %408 = vmatpush.bf16.msra.mxu0 %v956_v2  ;;  %999 = vmatpush.bf16.msra.mxu2 %v956_v2  ;;  %v959_v13 = vld [vmem:[%s1408_s1 + $0x48] sm:$0xff]  ;;  %v958_v15 = vld [vmem:[%s1408_s1 + $0x40] sm:$0xff]  ;;  %v969_v29 = vld [vmem:[%s1409_s0 + $0x14] sm:$0xf0] }
   0x7   :  { %497 = vmatpush.bf16.msra.mxu1 %v964_v3  ;;  %1007 = vmatpush.bf16.msra.mxu3 %v964_v3  ;;  %v760_v16 = vld [vmem:[%s1409_s0] sm:$0xf]  ;;  %v967_v17 = vld [vmem:[%s1409_s0 + $0x4] sm:$0xf0]  ;;  %v966_v20 = vld [vmem:[%s1409_s0 + $0x4] sm:$0xf]  ;;  %v769_v36 = vor.u32 %v969_v29, %v768_v28 }
   0x8   :  { %v824_v18 = vld [vmem:[%s1409_s0 + $0x80] sm:$0xf]  ;;  %v983_v19 = vld [vmem:[%s1409_s0 + $0x84] sm:$0xf0]  ;;  %v762_v21 = vld [vmem:[%s1409_s0 + $0x8] sm:$0xf0]  ;;  %v761_v24 = vor.u32 %v967_v17, %v760_v16 }
   0x9   :  { %v982_v22 = vld [vmem:[%s1409_s0 + $0x84] sm:$0xf]  ;;  %v826_v23 = vld [vmem:[%s1409_s0 + $0x88] sm:$0xf0]  ;;  %v825_v25 = vor.u32 %v983_v19, %v824_v18  ;;  %v765_v26 = vor.u32 %v966_v20, %v762_v21  ;;  %v832_v30 = vld [vmem:[%s1409_s0 + $0x90] sm:$0xf] }
   0xa   :  { %409 = vmatpush.bf16.msra.mxu0 %v955_v4  ;;  %1000 = vmatpush.bf16.msra.mxu2 %v955_v4  ;;  %v829_v27 = vor.u32 %v982_v22, %v826_v23  ;;  %v985_v31 = vld [vmem:[%s1409_s0 + $0x94] sm:$0xf0]  ;;  %v968_v32 = vld [vmem:[%s1409_s0 + $0x14] sm:$0xf]  ;;  %v770_v33 = vld [vmem:[%s1409_s0 + $0x18] sm:$0xf0] }
   0xb   :  { %498 = vmatpush.bf16.msra.mxu1 %v963_v5  ;;  %1008 = vmatpush.bf16.msra.mxu3 %v963_v5  ;;  %v984_v34 = vld [vmem:[%s1409_s0 + $0x94] sm:$0xf]  ;;  %v834_v35 = vld [vmem:[%s1409_s0 + $0x98] sm:$0xf0]  ;;  %v833_v37 = vor.u32 %v985_v31, %v832_v30  ;;  %v773_v38 = vor.u32 %v968_v32, %v770_v33  ;;  %v776_v40 = vld [vmem:[%s1409_s0 + $0x20] sm:$0xf] }
   0xc   :  { %v837_v39 = vor.u32 %v984_v34, %v834_v35  ;;  %v971_v41 = vld [vmem:[%s1409_s0 + $0x24] sm:$0xf0]  ;;  %v840_v42 = vld [vmem:[%s1409_s0 + $0xa0] sm:$0xf]  ;;  %v970_v44 = vld [vmem:[%s1409_s0 + $0x24] sm:$0xf] }
   0xd   :  { %v987_v43 = vld [vmem:[%s1409_s0 + $0xa4] sm:$0xf0]  ;;  %v778_v45 = vld [vmem:[%s1409_s0 + $0x28] sm:$0xf0]  ;;  %v986_v46 = vld [vmem:[%s1409_s0 + $0xa4] sm:$0xf]  ;;  %v777_v48 = vor.u32 %v971_v41, %v776_v40 }
   0xe   :  { %410 = vmatpush.bf16.msra.mxu0 %v954_v6  ;;  %1001 = vmatpush.bf16.msra.mxu2 %v954_v6  ;;  %v842_v47 = vld [vmem:[%s1409_s0 + $0xa8] sm:$0xf0]  ;;  %v841_v49 = vor.u32 %v987_v43, %v840_v42  ;;  %v781_v50 = vor.u32 %v970_v44, %v778_v45  ;;  %v784_v52 = vld [vmem:[%s1409_s0 + $0x30] sm:$0xf]  ;;  %v973_v53 = vld [vmem:[%s1409_s0 + $0x34] sm:$0xf0] }
   0xf   :  { %499 = vmatpush.bf16.msra.mxu1 %v962_v7  ;;  %1009 = vmatpush.bf16.msra.mxu3 %v962_v7  ;;  %v845_v51 = vor.u32 %v986_v46, %v842_v47  ;;  %v848_v54 = vld [vmem:[%s1409_s0 + $0xb0] sm:$0xf]  ;;  %v989_v55 = vld [vmem:[%s1409_s0 + $0xb4] sm:$0xf0]  ;;  %v972_v56 = vld [vmem:[%s1409_s0 + $0x34] sm:$0xf]  ;;  %v785_v60 = vor.u32 %v973_v53, %v784_v52 }
  0x10   :  { %v786_v57 = vld [vmem:[%s1409_s0 + $0x38] sm:$0xf0]  ;;  %v988_v58 = vld [vmem:[%s1409_s0 + $0xb4] sm:$0xf]  ;;  %v849_v61 = vor.u32 %v989_v55, %v848_v54  ;;  %v792_v0 = vld [vmem:[%s1409_s0 + $0x40] sm:$0xf] }
  0x11   :  { %v850_v59 = vld [vmem:[%s1409_s0 + $0xb8] sm:$0xf0]  ;;  %v789_v62 = vor.u32 %v972_v56, %v786_v57  ;;  %v975_v1 = vld [vmem:[%s1409_s0 + $0x44] sm:$0xf0]  ;;  %v856_v2 = vld [vmem:[%s1409_s0 + $0xc0] sm:$0xf] }
  0x12   :  { %411 = vmatpush.bf16.msra.mxu0 %v953_v8  ;;  %1002 = vmatpush.bf16.msra.mxu2 %v953_v8  ;;  %v853_v63 = vor.u32 %v988_v58, %v850_v59  ;;  %v991_v3 = vld [vmem:[%s1409_s0 + $0xc4] sm:$0xf0]  ;;  %v974_v4 = vld [vmem:[%s1409_s0 + $0x44] sm:$0xf]  ;;  %v794_v5 = vld [vmem:[%s1409_s0 + $0x48] sm:$0xf0]  ;;  %v793_v8 = vor.u32 %v975_v1, %v792_v0 }
  0x13   :  { %500 = vmatpush.bf16.msra.mxu1 %v961_v9  ;;  %1010 = vmatpush.bf16.msra.mxu3 %v961_v9  ;;  %v990_v6 = vld [vmem:[%s1409_s0 + $0xc4] sm:$0xf]  ;;  %v858_v7 = vld [vmem:[%s1409_s0 + $0xc8] sm:$0xf0]  ;;  %v857_v9 = vor.u32 %v991_v3, %v856_v2  ;;  %v976_v16 = vld [vmem:[%s1409_s0 + $0x54] sm:$0xf] }
  0x14   :  { %v802_v17 = vld [vmem:[%s1409_s0 + $0x58] sm:$0xf0]  ;;  %v992_v18 = vld [vmem:[%s1409_s0 + $0xd4] sm:$0xf]  ;;  %v978_v28 = vld [vmem:[%s1409_s0 + $0x64] sm:$0xf] }
  0x15   :  { %v866_v19 = vld [vmem:[%s1409_s0 + $0xd8] sm:$0xf0]  ;;  %v805_v22 = vor.u32 %v976_v16, %v802_v17  ;;  %v810_v29 = vld [vmem:[%s1409_s0 + $0x68] sm:$0xf0]  ;;  %v994_v30 = vld [vmem:[%s1409_s0 + $0xe4] sm:$0xf] }
  0x16   :  { %412 = vmatpush.bf16.msra.mxu0 %v952_v10  ;;  %1003 = vmatpush.bf16.msra.mxu2 %v952_v10  ;;  %v797_v10 = vor.u32 %v974_v4, %v794_v5  ;;  %v869_v23 = vor.u32 %v992_v18, %v866_v19  ;;  %v874_v31 = vld [vmem:[%s1409_s0 + $0xe8] sm:$0xf0]  ;;  %v813_v34 = vor.u32 %v978_v28, %v810_v29  ;;  %v980_v40 = vld [vmem:[%s1409_s0 + $0x74] sm:$0xf]  ;;  %v818_v41 = vld [vmem:[%s1409_s0 + $0x78] sm:$0xf0] }
  0x17   :  { %501 = vmatpush.bf16.msra.mxu1 %v960_v11  ;;  %1011 = vmatpush.bf16.msra.mxu3 %v960_v11  ;;  %v861_v11 = vor.u32 %v990_v6, %v858_v7  ;;  %v877_v35 = vor.u32 %v994_v30, %v874_v31  ;;  %v996_v42 = vld [vmem:[%s1409_s0 + $0xf4] sm:$0xf]  ;;  %v882_v43 = vld [vmem:[%s1409_s0 + $0xf8] sm:$0xf0]  ;;  %v821_v46 = vor.u32 %v980_v40, %v818_v41 }
  0x18   :  { %v885_v47 = vor.u32 %v996_v42, %v882_v43 }
  0x1a   :  { %413 = vmatpush.bf16.msra.mxu0 %v951_v12  ;;  %1004 = vmatpush.bf16.msra.mxu2 %v951_v12  ;;  %v800_v12 = vld [vmem:[%s1409_s0 + $0x50] sm:$0xf] }
  0x1b   :  { %502 = vmatpush.bf16.msra.mxu1 %v959_v13  ;;  %1012 = vmatpush.bf16.msra.mxu3 %v959_v13  ;;  %v977_v13 = vld [vmem:[%s1409_s0 + $0x54] sm:$0xf0] }
  0x1c   :  { %v801_v20 = vor.u32 %v977_v13, %v800_v12 }
  0x1e   :  { %414 = vmatpush.bf16.msra.mxu0 %v950_v14  ;;  %1005 = vmatpush.bf16.msra.mxu2 %v950_v14  ;;  %v864_v14 = vld [vmem:[%s1409_s0 + $0xd0] sm:$0xf] }
  0x1f   :  { %503 = vmatpush.bf16.msra.mxu1 %v958_v15  ;;  %1013 = vmatpush.bf16.msra.mxu3 %v958_v15  ;;  %v993_v15 = vld [vmem:[%s1409_s0 + $0xd4] sm:$0xf0] }
  0x20   :  { %v865_v21 = vor.u32 %v993_v15, %v864_v14 }
  0x21   :  { %415 = vmatmul.bf16.vlgmr.msra.gmra.mxu0 %v761_v24  ;;  %455 = vmatmul.bf16.vlgmr.msra.gmra.mxu2 %v825_v25  ;;  %v808_v24 = vld [vmem:[%s1409_s0 + $0x60] sm:$0xf]  ;;  %v979_v25 = vld [vmem:[%s1409_s0 + $0x64] sm:$0xf0] }
  0x22   :  { %504 = vmatmul.bf16.vlgmr.msra.gmra.mxu1 %v765_v26  ;;  %544 = vmatmul.bf16.vlgmr.msra.gmra.mxu3 %v829_v27  ;;  %v872_v26 = vld [vmem:[%s1409_s0 + $0xe0] sm:$0xf]  ;;  %v995_v27 = vld [vmem:[%s1409_s0 + $0xe4] sm:$0xf0]  ;;  %v809_v32 = vor.u32 %v979_v25, %v808_v24 }
  0x23   :  { %v873_v33 = vor.u32 %v995_v27, %v872_v26 }
  0x31   :  { %420 = vmatmul.bf16.gmra.mxu0 %v769_v36  ;;  %460 = vmatmul.bf16.gmra.mxu2 %v833_v37  ;;  %v816_v36 = vld [vmem:[%s1409_s0 + $0x70] sm:$0xf]  ;;  %v981_v37 = vld [vmem:[%s1409_s0 + $0x74] sm:$0xf0] }
  0x32   :  { %509 = vmatmul.bf16.gmra.mxu1 %v773_v38  ;;  %549 = vmatmul.bf16.gmra.mxu3 %v837_v39  ;;  %v880_v38 = vld [vmem:[%s1409_s0 + $0xf0] sm:$0xf]  ;;  %v997_v39 = vld [vmem:[%s1409_s0 + $0xf4] sm:$0xf0]  ;;  %v817_v44 = vor.u32 %v981_v37, %v816_v36 }
  0x33   :  { %v881_v45 = vor.u32 %v997_v39, %v880_v38 }
  0x41   :  { %425 = vmatmul.bf16.gmra.mxu0 %v777_v48  ;;  %465 = vmatmul.bf16.gmra.mxu2 %v841_v49  ;;  %v1278_v49 = vld [vmem:[%s1410_s2] ss:$0 sm:$0xff] }
  0x42   :  { %514 = vmatmul.bf16.gmra.mxu1 %v781_v50  ;;  %554 = vmatmul.bf16.gmra.mxu3 %v845_v51 }
  0x51   :  { %430 = vmatmul.bf16.gmra.mxu0 %v785_v60  ;;  %470 = vmatmul.bf16.gmra.mxu2 %v849_v61 }
  0x52   :  { %519 = vmatmul.bf16.gmra.mxu1 %v789_v62  ;;  %559 = vmatmul.bf16.gmra.mxu3 %v853_v63 }
  0x61   :  { %435 = vmatmul.bf16.gmra.mxu0 %v793_v8  ;;  %475 = vmatmul.bf16.gmra.mxu2 %v857_v9 }
  0x62   :  { %524 = vmatmul.bf16.gmra.mxu1 %v797_v10  ;;  %564 = vmatmul.bf16.gmra.mxu3 %v861_v11 }
  0x71   :  { %440 = vmatmul.bf16.gmra.mxu0 %v801_v20  ;;  %480 = vmatmul.bf16.gmra.mxu2 %v865_v21 }
  0x72   :  { %529 = vmatmul.bf16.gmra.mxu1 %v805_v22  ;;  %569 = vmatmul.bf16.gmra.mxu3 %v869_v23 }
  0x81   :  { %445 = vmatmul.bf16.gmra.mxu0 %v809_v32  ;;  %485 = vmatmul.bf16.gmra.mxu2 %v873_v33 }
  0x82   :  { %534 = vmatmul.bf16.gmra.mxu1 %v813_v34  ;;  %574 = vmatmul.bf16.gmra.mxu3 %v877_v35 }
  0x91   :  { %450 = vmatmul.bf16.gmra.mxu0 %v817_v44  ;;  %490 = vmatmul.bf16.gmra.mxu2 %v881_v45 }
  0x92   :  { %539 = vmatmul.bf16.gmra.mxu1 %v821_v46  ;;  %579 = vmatmul.bf16.gmra.mxu3 %v885_v47 }
  0x9e   :  { %v416_v48 = vpop.f32.mrf.mxu0 }
  0x9f   :  { %v505_v50 = vpop.f32.mrf.mxu1 }
  0xa0   :  { %v506_v51 = vadd.f32 %v505_v50, %v416_v48 }
  0xa2   :  { %v688_v52 = vadd.f32 %v1278_v49, %v506_v51 }
  0xa4   :  { %720 = vst [vmem:[%s1411_s3] sm:$0xff] %v688_v52  ;;  %v456_v53 = vpop.f32.mrf.mxu2 }
  0xa5   :  { %v545_v54 = vpop.f32.mrf.mxu3 }
  0xa6   :  { %v546_v55 = vadd.f32 %v545_v54, %v456_v53  ;;  %v418_v56 = vpop.f32.mrf.mxu0 }
  0xa7   :  { %v507_v57 = vpop.f32.mrf.mxu1 }
  0xa8   :  { %v704_v58 = vadd.f32 %v1278_v49, %v546_v55  ;;  %v508_v59 = vadd.f32 %v507_v57, %v418_v56 }
  0xaa   :  { %736 = vst [vmem:[%s1411_s3 + $0x80] sm:$0xff] %v704_v58  ;;  %v689_v60 = vadd.f32 %v1278_v49, %v508_v59 }
  0xac   :  { %721 = vst [vmem:[%s1411_s3 + $0x8] sm:$0xff] %v689_v60  ;;  %v458_v61 = vpop.f32.mrf.mxu2 }
  0xad   :  { %v547_v62 = vpop.f32.mrf.mxu3 }
  0xae   :  { %v548_v63 = vadd.f32 %v547_v62, %v458_v61  ;;  %v421_v0 = vpop.f32.mrf.mxu0 }
  0xaf   :  { %v510_v1 = vpop.f32.mrf.mxu1 }
  0xb0   :  { %v705_v2 = vadd.f32 %v1278_v49, %v548_v63  ;;  %v511_v3 = vadd.f32 %v510_v1, %v421_v0 }
  0xb2   :  { %737 = vst [vmem:[%s1411_s3 + $0x88] sm:$0xff] %v705_v2  ;;  %v690_v4 = vadd.f32 %v1278_v49, %v511_v3 }
  0xb4   :  { %722 = vst [vmem:[%s1411_s3 + $0x10] sm:$0xff] %v690_v4  ;;  %v461_v5 = vpop.f32.mrf.mxu2 }
  0xb5   :  { %v550_v6 = vpop.f32.mrf.mxu3 }
  0xb6   :  { %v551_v7 = vadd.f32 %v550_v6, %v461_v5  ;;  %v423_v8 = vpop.f32.mrf.mxu0 }
  0xb7   :  { %v512_v9 = vpop.f32.mrf.mxu1 }
  0xb8   :  { %v706_v10 = vadd.f32 %v1278_v49, %v551_v7  ;;  %v513_v11 = vadd.f32 %v512_v9, %v423_v8 }
  0xba   :  { %738 = vst [vmem:[%s1411_s3 + $0x90] sm:$0xff] %v706_v10  ;;  %v691_v12 = vadd.f32 %v1278_v49, %v513_v11 }
  0xbc   :  { %723 = vst [vmem:[%s1411_s3 + $0x18] sm:$0xff] %v691_v12  ;;  %v463_v13 = vpop.f32.mrf.mxu2 }
  0xbd   :  { %v552_v14 = vpop.f32.mrf.mxu3 }
  0xbe   :  { %v553_v15 = vadd.f32 %v552_v14, %v463_v13  ;;  %v426_v16 = vpop.f32.mrf.mxu0 }
  0xbf   :  { %v515_v17 = vpop.f32.mrf.mxu1 }
  0xc0   :  { %v707_v18 = vadd.f32 %v1278_v49, %v553_v15  ;;  %v516_v19 = vadd.f32 %v515_v17, %v426_v16 }
  0xc2   :  { %739 = vst [vmem:[%s1411_s3 + $0x98] sm:$0xff] %v707_v18  ;;  %v692_v20 = vadd.f32 %v1278_v49, %v516_v19 }
  0xc4   :  { %724 = vst [vmem:[%s1411_s3 + $0x20] sm:$0xff] %v692_v20  ;;  %v466_v21 = vpop.f32.mrf.mxu2 }
  0xc5   :  { %v555_v22 = vpop.f32.mrf.mxu3 }
  0xc6   :  { %v556_v23 = vadd.f32 %v555_v22, %v466_v21  ;;  %v428_v24 = vpop.f32.mrf.mxu0 }
  0xc7   :  { %v517_v25 = vpop.f32.mrf.mxu1 }
  0xc8   :  { %v708_v26 = vadd.f32 %v1278_v49, %v556_v23  ;;  %v518_v27 = vadd.f32 %v517_v25, %v428_v24 }
  0xca   :  { %740 = vst [vmem:[%s1411_s3 + $0xa0] sm:$0xff] %v708_v26  ;;  %v693_v28 = vadd.f32 %v1278_v49, %v518_v27 }
  0xcc   :  { %725 = vst [vmem:[%s1411_s3 + $0x28] sm:$0xff] %v693_v28  ;;  %v468_v29 = vpop.f32.mrf.mxu2 }
  0xcd   :  { %v557_v30 = vpop.f32.mrf.mxu3 }
  0xce   :  { %v558_v31 = vadd.f32 %v557_v30, %v468_v29  ;;  %v431_v32 = vpop.f32.mrf.mxu0 }
  0xcf   :  { %v520_v33 = vpop.f32.mrf.mxu1 }
  0xd0   :  { %v709_v34 = vadd.f32 %v1278_v49, %v558_v31  ;;  %v521_v35 = vadd.f32 %v520_v33, %v431_v32 }
  0xd2   :  { %741 = vst [vmem:[%s1411_s3 + $0xa8] sm:$0xff] %v709_v34  ;;  %v694_v36 = vadd.f32 %v1278_v49, %v521_v35 }
  0xd4   :  { %726 = vst [vmem:[%s1411_s3 + $0x30] sm:$0xff] %v694_v36  ;;  %v471_v37 = vpop.f32.mrf.mxu2 }
  0xd5   :  { %v560_v38 = vpop.f32.mrf.mxu3 }
  0xd6   :  { %v561_v39 = vadd.f32 %v560_v38, %v471_v37  ;;  %v433_v40 = vpop.f32.mrf.mxu0 }
  0xd7   :  { %v522_v41 = vpop.f32.mrf.mxu1 }
  0xd8   :  { %v710_v42 = vadd.f32 %v1278_v49, %v561_v39  ;;  %v523_v43 = vadd.f32 %v522_v41, %v433_v40 }
  0xda   :  { %742 = vst [vmem:[%s1411_s3 + $0xb0] sm:$0xff] %v710_v42  ;;  %v695_v44 = vadd.f32 %v1278_v49, %v523_v43 }
  0xdc   :  { %727 = vst [vmem:[%s1411_s3 + $0x38] sm:$0xff] %v695_v44  ;;  %v473_v45 = vpop.f32.mrf.mxu2 }
  0xdd   :  { %v562_v46 = vpop.f32.mrf.mxu3 }
  0xde   :  { %v563_v47 = vadd.f32 %v562_v46, %v473_v45  ;;  %v436_v48 = vpop.f32.mrf.mxu0 }
  0xdf   :  { %v525_v50 = vpop.f32.mrf.mxu1 }
  0xe0   :  { %v711_v51 = vadd.f32 %v1278_v49, %v563_v47  ;;  %v526_v52 = vadd.f32 %v525_v50, %v436_v48 }
  0xe2   :  { %743 = vst [vmem:[%s1411_s3 + $0xb8] sm:$0xff] %v711_v51  ;;  %v696_v53 = vadd.f32 %v1278_v49, %v526_v52 }
  0xe4   :  { %728 = vst [vmem:[%s1411_s3 + $0x40] sm:$0xff] %v696_v53  ;;  %v476_v54 = vpop.f32.mrf.mxu2 }
  0xe5   :  { %v565_v55 = vpop.f32.mrf.mxu3 }
  0xe6   :  { %v566_v56 = vadd.f32 %v565_v55, %v476_v54  ;;  %v438_v57 = vpop.f32.mrf.mxu0 }
  0xe7   :  { %v527_v58 = vpop.f32.mrf.mxu1 }
  0xe8   :  { %v712_v59 = vadd.f32 %v1278_v49, %v566_v56  ;;  %v528_v60 = vadd.f32 %v527_v58, %v438_v57 }
  0xea   :  { %744 = vst [vmem:[%s1411_s3 + $0xc0] sm:$0xff] %v712_v59  ;;  %v697_v61 = vadd.f32 %v1278_v49, %v528_v60 }
  0xec   :  { %729 = vst [vmem:[%s1411_s3 + $0x48] sm:$0xff] %v697_v61  ;;  %v478_v62 = vpop.f32.mrf.mxu2 }
  0xed   :  { %v567_v63 = vpop.f32.mrf.mxu3 }
  0xee   :  { %v568_v0 = vadd.f32 %v567_v63, %v478_v62  ;;  %v441_v1 = vpop.f32.mrf.mxu0 }
  0xef   :  { %v530_v2 = vpop.f32.mrf.mxu1 }
  0xf0   :  { %v713_v3 = vadd.f32 %v1278_v49, %v568_v0  ;;  %v531_v4 = vadd.f32 %v530_v2, %v441_v1 }
  0xf2   :  { %745 = vst [vmem:[%s1411_s3 + $0xc8] sm:$0xff] %v713_v3  ;;  %v698_v5 = vadd.f32 %v1278_v49, %v531_v4 }
  0xf4   :  { %730 = vst [vmem:[%s1411_s3 + $0x50] sm:$0xff] %v698_v5  ;;  %v481_v6 = vpop.f32.mrf.mxu2 }
  0xf5   :  { %v570_v7 = vpop.f32.mrf.mxu3 }
  0xf6   :  { %v571_v8 = vadd.f32 %v570_v7, %v481_v6  ;;  %v443_v9 = vpop.f32.mrf.mxu0 }
  0xf7   :  { %v532_v10 = vpop.f32.mrf.mxu1 }
  0xf8   :  { %v714_v11 = vadd.f32 %v1278_v49, %v571_v8  ;;  %v533_v12 = vadd.f32 %v532_v10, %v443_v9 }
  0xfa   :  { %746 = vst [vmem:[%s1411_s3 + $0xd0] sm:$0xff] %v714_v11  ;;  %v699_v13 = vadd.f32 %v1278_v49, %v533_v12 }
  0xfc   :  { %731 = vst [vmem:[%s1411_s3 + $0x58] sm:$0xff] %v699_v13  ;;  %v483_v14 = vpop.f32.mrf.mxu2 }
  0xfd   :  { %v572_v15 = vpop.f32.mrf.mxu3 }
  0xfe   :  { %v573_v16 = vadd.f32 %v572_v15, %v483_v14  ;;  %v446_v17 = vpop.f32.mrf.mxu0 }
  0xff   :  { %v535_v18 = vpop.f32.mrf.mxu1 }
 0x100   :  { %v715_v19 = vadd.f32 %v1278_v49, %v573_v16  ;;  %v536_v20 = vadd.f32 %v535_v18, %v446_v17 }
 0x102   :  { %747 = vst [vmem:[%s1411_s3 + $0xd8] sm:$0xff] %v715_v19  ;;  %v700_v21 = vadd.f32 %v1278_v49, %v536_v20 }
 0x104   :  { %732 = vst [vmem:[%s1411_s3 + $0x60] sm:$0xff] %v700_v21  ;;  %v486_v22 = vpop.f32.mrf.mxu2 }
 0x105   :  { %v575_v23 = vpop.f32.mrf.mxu3 }
 0x106   :  { %v576_v24 = vadd.f32 %v575_v23, %v486_v22  ;;  %v448_v25 = vpop.f32.mrf.mxu0 }
 0x107   :  { %v537_v26 = vpop.f32.mrf.mxu1 }
 0x108   :  { %v716_v27 = vadd.f32 %v1278_v49, %v576_v24  ;;  %v538_v28 = vadd.f32 %v537_v26, %v448_v25 }
 0x10a   :  { %748 = vst [vmem:[%s1411_s3 + $0xe0] sm:$0xff] %v716_v27  ;;  %v701_v29 = vadd.f32 %v1278_v49, %v538_v28 }
 0x10c   :  { %733 = vst [vmem:[%s1411_s3 + $0x68] sm:$0xff] %v701_v29  ;;  %v488_v30 = vpop.f32.mrf.mxu2 }
 0x10d   :  { %v577_v31 = vpop.f32.mrf.mxu3 }
 0x10e   :  { %v578_v32 = vadd.f32 %v577_v31, %v488_v30  ;;  %v451_v33 = vpop.f32.mrf.mxu0 }
 0x10f   :  { %v540_v34 = vpop.f32.mrf.mxu1 }
 0x110   :  { %v717_v35 = vadd.f32 %v1278_v49, %v578_v32  ;;  %v541_v36 = vadd.f32 %v540_v34, %v451_v33 }
 0x112   :  { %749 = vst [vmem:[%s1411_s3 + $0xe8] sm:$0xff] %v717_v35  ;;  %v702_v37 = vadd.f32 %v1278_v49, %v541_v36 }
 0x114   :  { %734 = vst [vmem:[%s1411_s3 + $0x70] sm:$0xff] %v702_v37  ;;  %v491_v38 = vpop.f32.mrf.mxu2 }
 0x115   :  { %v580_v39 = vpop.f32.mrf.mxu3 }
 0x116   :  { %v581_v40 = vadd.f32 %v580_v39, %v491_v38  ;;  %v453_v41 = vpop.f32.mrf.mxu0 }
 0x117   :  { %v542_v42 = vpop.f32.mrf.mxu1 }
 0x118   :  { %v718_v43 = vadd.f32 %v1278_v49, %v581_v40  ;;  %v543_v44 = vadd.f32 %v542_v42, %v453_v41 }
 0x11a   :  { %750 = vst [vmem:[%s1411_s3 + $0xf0] sm:$0xff] %v718_v43  ;;  %v703_v45 = vadd.f32 %v1278_v49, %v543_v44 }
 0x11c   :  { %735 = vst [vmem:[%s1411_s3 + $0x78] sm:$0xff] %v703_v45  ;;  %v493_v46 = vpop.f32.mrf.mxu2 }
 0x11d   :  { %v582_v47 = vpop.f32.mrf.mxu3 }
 0x11e   :  { %v583_v48 = vadd.f32 %v582_v47, %v493_v46 }
 0x120   :  { %v719_v50 = vadd.f32 %v1278_v49, %v583_v48 }
 0x122   :  { %751 = vst [vmem:[%s1411_s3 + $0xf8] sm:$0xff] %v719_v50 }

// kernel: gnn_forward.5
= control target key start
LH: loop header
LB: loop body
LE: loop exit
PB: predicated region body
PF: predicated region fallthrough
CT: control target
= control target key end

     0   :  { %s1792_s1 = inlined_call_operand.vmem [shape: bf16[256,128], index: 1, kind: input, shape index: {}]   ;;  %s1793_s0 = inlined_call_operand.vmem [shape: bf16[256,256], index: 0, kind: input, shape index: {}]   ;;  %s1794_s2 = inlined_call_operand.vmem [shape: f32[1,128], index: 2, kind: input, shape index: {}]   ;;  %s1795_s3 = inlined_call_operand.vmem [shape: bf16[128,128], index: 3, kind: input, shape index: {}]   ;;  %s1796_s4 = inlined_call_operand.vmem [shape: bf16[256,128], index: 4, kind: output, shape index: {}]  }
   0x1   :  { %v1225_v0 = vld [vmem:[%s1792_s1 + $0x38] sm:$0xff]  ;;  %v1224_v2 = vld [vmem:[%s1792_s1 + $0x30] sm:$0xff]  ;;  %v1223_v4 = vld [vmem:[%s1792_s1 + $0x28] sm:$0xff] }
   0x2   :  { %v1233_v1 = vld [vmem:[%s1792_s1 + $0x78] sm:$0xff]  ;;  %410 = vmatpush.bf16.msra.mxu0 %v1225_v0  ;;  %1369 = vmatpush.bf16.msra.mxu3 %v1225_v0  ;;  %v1232_v3 = vld [vmem:[%s1792_s1 + $0x70] sm:$0xff]  ;;  %v1231_v5 = vld [vmem:[%s1792_s1 + $0x68] sm:$0xff] }
   0x3   :  { %499 = vmatpush.bf16.msra.mxu1 %v1233_v1  ;;  %v1222_v6 = vld [vmem:[%s1792_s1 + $0x20] sm:$0xff]  ;;  %v1221_v8 = vld [vmem:[%s1792_s1 + $0x18] sm:$0xff]  ;;  %v1220_v10 = vld [vmem:[%s1792_s1 + $0x10] sm:$0xff] }
   0x4   :  { %v1230_v7 = vld [vmem:[%s1792_s1 + $0x60] sm:$0xff]  ;;  %v1229_v9 = vld [vmem:[%s1792_s1 + $0x58] sm:$0xff]  ;;  %v1228_v11 = vld [vmem:[%s1792_s1 + $0x50] sm:$0xff] }
   0x5   :  { %v1219_v12 = vld [vmem:[%s1792_s1 + $0x8] sm:$0xff]  ;;  %v1218_v14 = vld [vmem:[%s1792_s1] sm:$0xff]  ;;  %v1004_v25 = vld [vmem:[%s1793_s0 + $0x10] sm:$0xf] }
   0x6   :  { %411 = vmatpush.bf16.msra.mxu0 %v1224_v2  ;;  %1370 = vmatpush.bf16.msra.mxu3 %v1224_v2  ;;  %v1227_v13 = vld [vmem:[%s1792_s1 + $0x48] sm:$0xff]  ;;  %v996_v15 = vld [vmem:[%s1793_s0] sm:$0xf]  ;;  %v1234_v20 = vld [vmem:[%s1793_s0 + $0x4] sm:$0xf] }
   0x7   :  { %500 = vmatpush.bf16.msra.mxu1 %v1232_v3  ;;  %v1235_v16 = vld [vmem:[%s1793_s0 + $0x4] sm:$0xf0]  ;;  %v1092_v17 = vld [vmem:[%s1793_s0 + $0xc0] sm:$0xf]  ;;  %v998_v21 = vld [vmem:[%s1793_s0 + $0x8] sm:$0xf0] }
   0x8   :  { %v1259_v18 = vld [vmem:[%s1793_s0 + $0xc4] sm:$0xf0]  ;;  %v1226_v19 = vld [vmem:[%s1792_s1 + $0x40] sm:$0xff]  ;;  %v997_v22 = vor.u32 %v1235_v16, %v996_v15  ;;  %v1001_v24 = vor.u32 %v1234_v20, %v998_v21  ;;  %v1237_v26 = vld [vmem:[%s1793_s0 + $0x14] sm:$0xf0] }
   0x9   :  { %v1093_v23 = vor.u32 %v1259_v18, %v1092_v17  ;;  %v1100_v27 = vld [vmem:[%s1793_s0 + $0xd0] sm:$0xf]  ;;  %v1261_v28 = vld [vmem:[%s1793_s0 + $0xd4] sm:$0xf0]  ;;  %v1236_v29 = vld [vmem:[%s1793_s0 + $0x14] sm:$0xf]  ;;  %v1005_v31 = vor.u32 %v1237_v26, %v1004_v25 }
   0xa   :  { %412 = vmatpush.bf16.msra.mxu0 %v1223_v4  ;;  %1371 = vmatpush.bf16.msra.mxu3 %v1223_v4  ;;  %v1006_v30 = vld [vmem:[%s1793_s0 + $0x18] sm:$0xf0]  ;;  %v1101_v32 = vor.u32 %v1261_v28, %v1100_v27  ;;  %v1012_v34 = vld [vmem:[%s1793_s0 + $0x20] sm:$0xf]  ;;  %v1239_v35 = vld [vmem:[%s1793_s0 + $0x24] sm:$0xf0] }
   0xb   :  { %501 = vmatpush.bf16.msra.mxu1 %v1231_v5  ;;  %v1009_v33 = vor.u32 %v1236_v29, %v1006_v30  ;;  %v1108_v36 = vld [vmem:[%s1793_s0 + $0xe0] sm:$0xf]  ;;  %v1263_v37 = vld [vmem:[%s1793_s0 + $0xe4] sm:$0xf0]  ;;  %v1238_v38 = vld [vmem:[%s1793_s0 + $0x24] sm:$0xf]  ;;  %v1013_v40 = vor.u32 %v1239_v35, %v1012_v34 }
   0xc   :  { %v1014_v39 = vld [vmem:[%s1793_s0 + $0x28] sm:$0xf0]  ;;  %v1109_v41 = vor.u32 %v1263_v37, %v1108_v36  ;;  %v1020_v43 = vld [vmem:[%s1793_s0 + $0x30] sm:$0xf]  ;;  %v1241_v44 = vld [vmem:[%s1793_s0 + $0x34] sm:$0xf0] }
   0xd   :  { %v1017_v42 = vor.u32 %v1238_v38, %v1014_v39  ;;  %v1116_v45 = vld [vmem:[%s1793_s0 + $0xf0] sm:$0xf]  ;;  %v1265_v46 = vld [vmem:[%s1793_s0 + $0xf4] sm:$0xf0]  ;;  %v1240_v47 = vld [vmem:[%s1793_s0 + $0x34] sm:$0xf]  ;;  %v1021_v49 = vor.u32 %v1241_v44, %v1020_v43 }
   0xe   :  { %413 = vmatpush.bf16.msra.mxu0 %v1222_v6  ;;  %1372 = vmatpush.bf16.msra.mxu3 %v1222_v6  ;;  %v1022_v48 = vld [vmem:[%s1793_s0 + $0x38] sm:$0xf0]  ;;  %v1117_v50 = vor.u32 %v1265_v46, %v1116_v45  ;;  %v1028_v52 = vld [vmem:[%s1793_s0 + $0x40] sm:$0xf]  ;;  %v1243_v53 = vld [vmem:[%s1793_s0 + $0x44] sm:$0xf0] }
   0xf   :  { %502 = vmatpush.bf16.msra.mxu1 %v1230_v7  ;;  %v1025_v51 = vor.u32 %v1240_v47, %v1022_v48  ;;  %v1258_v54 = vld [vmem:[%s1793_s0 + $0xc4] sm:$0xf]  ;;  %v1094_v55 = vld [vmem:[%s1793_s0 + $0xc8] sm:$0xf0]  ;;  %v1029_v58 = vor.u32 %v1243_v53, %v1028_v52  ;;  %v1273_v61 = vld [vmem:[%s1795_s3 + $0x38] sm:$0xff] }
  0x10   :  { %v1242_v56 = vld [vmem:[%s1793_s0 + $0x44] sm:$0xf]  ;;  %v1030_v57 = vld [vmem:[%s1793_s0 + $0x48] sm:$0xf0]  ;;  %v1097_v59 = vor.u32 %v1258_v54, %v1094_v55  ;;  %835 = vmatpush.bf16.msra.mxu2 %v1273_v61  ;;  %v1036_v62 = vld [vmem:[%s1793_s0 + $0x50] sm:$0xf] }
  0x11   :  { %v1033_v60 = vor.u32 %v1242_v56, %v1030_v57  ;;  %v1245_v63 = vld [vmem:[%s1793_s0 + $0x54] sm:$0xf0]  ;;  %v1260_v0 = vld [vmem:[%s1793_s0 + $0xd4] sm:$0xf]  ;;  %v1046_v15 = vld [vmem:[%s1793_s0 + $0x68] sm:$0xf0] }
  0x12   :  { %414 = vmatpush.bf16.msra.mxu0 %v1221_v8  ;;  %1373 = vmatpush.bf16.msra.mxu3 %v1221_v8  ;;  %v1244_v2 = vld [vmem:[%s1793_s0 + $0x54] sm:$0xf]  ;;  %v1037_v4 = vor.u32 %v1245_v63, %v1036_v62  ;;  %v1271_v8 = vld [vmem:[%s1795_s3 + $0x28] sm:$0xff]  ;;  %v1118_v25 = vld [vmem:[%s1793_s0 + $0xf8] sm:$0xf0] }
  0x13   :  { %503 = vmatpush.bf16.msra.mxu1 %v1229_v9  ;;  %v1268_v20 = vld [vmem:[%s1795_s3 + $0x10] sm:$0xff]  ;;  %v1267_v21 = vld [vmem:[%s1795_s3 + $0x8] sm:$0xff]  ;;  %v1054_v27 = vld [vmem:[%s1793_s0 + $0x78] sm:$0xf0] }
  0x14   :  { %v1248_v26 = vld [vmem:[%s1793_s0 + $0x74] sm:$0xf]  ;;  %v1266_v28 = vld [vmem:[%s1795_s3] sm:$0xff]  ;;  %v1062_v35 = vld [vmem:[%s1793_s0 + $0x88] sm:$0xf0] }
  0x15   :  { %v1250_v34 = vld [vmem:[%s1793_s0 + $0x84] sm:$0xf]  ;;  %v1068_v48 = vld [vmem:[%s1793_s0 + $0x90] sm:$0xf] }
  0x16   :  { %415 = vmatpush.bf16.msra.mxu0 %v1220_v10  ;;  %1374 = vmatpush.bf16.msra.mxu3 %v1220_v10  ;;  %v1044_v10 = vld [vmem:[%s1793_s0 + $0x60] sm:$0xf]  ;;  %v1065_v38 = vor.u32 %v1250_v34, %v1062_v35 }
  0x17   :  { %504 = vmatpush.bf16.msra.mxu1 %v1228_v11 }
  0x1a   :  { %416 = vmatpush.bf16.msra.mxu0 %v1219_v12  ;;  %1375 = vmatpush.bf16.msra.mxu3 %v1219_v12  ;;  %v1262_v12 = vld [vmem:[%s1793_s0 + $0xe4] sm:$0xf] }
  0x1b   :  { %505 = vmatpush.bf16.msra.mxu1 %v1227_v13 }
  0x1e   :  { %417 = vmatpush.bf16.msra.mxu0 %v1218_v14  ;;  %1376 = vmatpush.bf16.msra.mxu3 %v1218_v14  ;;  %v1246_v14 = vld [vmem:[%s1793_s0 + $0x64] sm:$0xf] }
  0x1f   :  { %506 = vmatpush.bf16.msra.mxu1 %v1226_v19  ;;  %v1049_v18 = vor.u32 %v1246_v14, %v1046_v15 }
  0x21   :  { %418 = vmatmul.bf16.vlgmr.msra.gmra.mxu0 %v997_v22  ;;  %478 = vmatmul.bf16.vlgmr.msra.gmra.mxu3 %v1093_v23  ;;  %v1052_v22 = vld [vmem:[%s1793_s0 + $0x70] sm:$0xf]  ;;  %v1249_v23 = vld [vmem:[%s1793_s0 + $0x74] sm:$0xf0] }
  0x22   :  { %1377 = vmatpush.bf16.msrb.mxu3 %v1233_v1  ;;  %507 = vmatmul.bf16.vlgmr.msra.gmra.mxu1 %v1001_v24  ;;  %v1102_v1 = vld [vmem:[%s1793_s0 + $0xd8] sm:$0xf0]  ;;  %v1264_v24 = vld [vmem:[%s1793_s0 + $0xf4] sm:$0xf]  ;;  %v1053_v29 = vor.u32 %v1249_v23, %v1052_v22  ;;  %v1084_v22 = vld [vmem:[%s1793_s0 + $0xb0] sm:$0xf] }
  0x23   :  { %v1121_v30 = vor.u32 %v1264_v24, %v1118_v25  ;;  %v1257_v23 = vld [vmem:[%s1793_s0 + $0xb4] sm:$0xf0]  ;;  %v1256_v24 = vld [vmem:[%s1793_s0 + $0xb4] sm:$0xf]  ;;  %v1086_v25 = vld [vmem:[%s1793_s0 + $0xb8] sm:$0xf0] }
  0x26   :  { %1378 = vmatpush.bf16.msrb.mxu3 %v1232_v3  ;;  %v1038_v3 = vld [vmem:[%s1793_s0 + $0x58] sm:$0xf0] }
  0x27   :  { %v1041_v6 = vor.u32 %v1244_v2, %v1038_v3  ;;  %v1076_v3 = vld [vmem:[%s1793_s0 + $0xa0] sm:$0xf] }
  0x2a   :  { %1379 = vmatpush.bf16.msrb.mxu3 %v1231_v5  ;;  %v1105_v5 = vor.u32 %v1260_v0, %v1102_v1 }
  0x2e   :  { %1380 = vmatpush.bf16.msrb.mxu3 %v1230_v7  ;;  %v1272_v7 = vld [vmem:[%s1795_s3 + $0x30] sm:$0xff] }
  0x2f   :  { %836 = vmatpush.bf16.msra.mxu2 %v1272_v7 }
  0x31   :  { %423 = vmatmul.bf16.gmra.mxu0 %v1005_v31  ;;  %483 = vmatmul.bf16.gmra.mxu3 %v1101_v32  ;;  %v1057_v31 = vor.u32 %v1248_v26, %v1054_v27  ;;  %v1060_v32 = vld [vmem:[%s1793_s0 + $0x80] sm:$0xf] }
  0x32   :  { %1381 = vmatpush.bf16.msrb.mxu3 %v1229_v9  ;;  %512 = vmatmul.bf16.gmra.mxu1 %v1009_v33  ;;  %v1270_v9 = vld [vmem:[%s1795_s3 + $0x20] sm:$0xff]  ;;  %v1251_v33 = vld [vmem:[%s1793_s0 + $0x84] sm:$0xf0] }
  0x33   :  { %837 = vmatpush.bf16.msra.mxu2 %v1271_v8  ;;  %v1061_v36 = vor.u32 %v1251_v33, %v1060_v32  ;;  %v1089_v32 = vor.u32 %v1256_v24, %v1086_v25 }
  0x36   :  { %1382 = vmatpush.bf16.msrb.mxu3 %v1228_v11  ;;  %v1247_v11 = vld [vmem:[%s1793_s0 + $0x64] sm:$0xf0] }
  0x37   :  { %838 = vmatpush.bf16.msra.mxu2 %v1270_v9  ;;  %v1045_v16 = vor.u32 %v1247_v11, %v1044_v10 }
  0x3a   :  { %1383 = vmatpush.bf16.msrb.mxu3 %v1227_v13  ;;  %v1110_v13 = vld [vmem:[%s1793_s0 + $0xe8] sm:$0xf0] }
  0x3b   :  { %v1113_v17 = vor.u32 %v1262_v12, %v1110_v13 }
  0x3e   :  { %1384 = vmatpush.bf16.msrb.mxu3 %v1226_v19  ;;  %v1269_v19 = vld [vmem:[%s1795_s3 + $0x18] sm:$0xff] }
  0x3f   :  { %839 = vmatpush.bf16.msra.mxu2 %v1269_v19 }
  0x41   :  { %428 = vmatmul.bf16.gmra.mxu0 %v1013_v40  ;;  %488 = vmatmul.bf16.gmra.mxu3 %v1109_v41  ;;  %v1650_v41 = vld [vmem:[%s1794_s2] ss:$0 sm:$0xff] }
  0x42   :  { %517 = vmatmul.bf16.gmra.mxu1 %v1017_v42  ;;  %1385 = vmatpush.bf16.msra.mxu3 %v1273_v61 }
  0x43   :  { %840 = vmatpush.bf16.msra.mxu2 %v1268_v20 }
  0x46   :  { %1386 = vmatpush.bf16.msra.mxu3 %v1272_v7 }
  0x47   :  { %841 = vmatpush.bf16.msra.mxu2 %v1267_v21 }
  0x4a   :  { %1387 = vmatpush.bf16.msra.mxu3 %v1271_v8 }
  0x4b   :  { %842 = vmatpush.bf16.msra.mxu2 %v1266_v28 }
  0x4e   :  { %1388 = vmatpush.bf16.msra.mxu3 %v1270_v9 }
  0x51   :  { %433 = vmatmul.bf16.gmra.mxu0 %v1021_v49  ;;  %493 = vmatmul.bf16.gmra.mxu3 %v1117_v50  ;;  %v1253_v49 = vld [vmem:[%s1793_s0 + $0x94] sm:$0xf0]  ;;  %v1252_v50 = vld [vmem:[%s1793_s0 + $0x94] sm:$0xf] }
  0x52   :  { %522 = vmatmul.bf16.gmra.mxu1 %v1025_v51  ;;  %1389 = vmatpush.bf16.msra.mxu3 %v1269_v19  ;;  %v1070_v51 = vld [vmem:[%s1793_s0 + $0x98] sm:$0xf0]  ;;  %v1069_v55 = vor.u32 %v1253_v49, %v1068_v48 }
  0x56   :  { %1390 = vmatpush.bf16.msra.mxu3 %v1268_v20 }
  0x5a   :  { %1391 = vmatpush.bf16.msra.mxu3 %v1267_v21 }
  0x5e   :  { %1392 = vmatpush.bf16.msra.mxu3 %v1266_v28 }
  0x61   :  { %438 = vmatmul.bf16.gmra.mxu0 %v1029_v58  ;;  %567 = vmatmul.bf16.vlgmr.msrb.gmra.mxu3 %v1097_v59  ;;  %v1073_v58 = vor.u32 %v1252_v50, %v1070_v51 }
  0x62   :  { %527 = vmatmul.bf16.gmra.mxu1 %v1033_v60 }
  0x71   :  { %443 = vmatmul.bf16.gmra.mxu0 %v1037_v4  ;;  %572 = vmatmul.bf16.gmra.mxu3 %v1105_v5  ;;  %v1255_v4 = vld [vmem:[%s1793_s0 + $0xa4] sm:$0xf0]  ;;  %v1254_v5 = vld [vmem:[%s1793_s0 + $0xa4] sm:$0xf] }
  0x72   :  { %532 = vmatmul.bf16.gmra.mxu1 %v1041_v6  ;;  %v1078_v6 = vld [vmem:[%s1793_s0 + $0xa8] sm:$0xf0]  ;;  %v1077_v10 = vor.u32 %v1255_v4, %v1076_v3 }
  0x73   :  { %v1081_v13 = vor.u32 %v1254_v5, %v1078_v6 }
  0x81   :  { %448 = vmatmul.bf16.gmra.mxu0 %v1045_v16  ;;  %577 = vmatmul.bf16.gmra.mxu3 %v1113_v17 }
  0x82   :  { %537 = vmatmul.bf16.gmra.mxu1 %v1049_v18 }
  0x91   :  { %453 = vmatmul.bf16.gmra.mxu0 %v1053_v29  ;;  %582 = vmatmul.bf16.gmra.mxu3 %v1121_v30  ;;  %v1085_v29 = vor.u32 %v1257_v23, %v1084_v22 }
  0x92   :  { %542 = vmatmul.bf16.gmra.mxu1 %v1057_v31 }
  0x9e   :  { %v419_v37 = vpop.f32.mrf.mxu0 }
  0x9f   :  { %v508_v39 = vpop.f32.mrf.mxu1 }
  0xa0   :  { %v509_v40 = vadd.f32 %v508_v39, %v419_v37 }
  0xa1   :  { %458 = vmatmul.bf16.gmra.mxu0 %v1061_v36 }
  0xa2   :  { %547 = vmatmul.bf16.gmra.mxu1 %v1065_v38  ;;  %v691_v45 = vadd.f32 %v1650_v41, %v509_v40 }
  0xa4   :  { %v1652_v42 = vpop.f32.mrf.mxu3  ;;  %v723_v52 = vmax.f32 %v691_v45, 0.0 }
  0xa6   :  { %v421_v43 = vpop.f32.mrf.mxu0 }
  0xa7   :  { %v510_v44 = vpop.f32.mrf.mxu1 }
  0xa8   :  { %v511_v46 = vadd.f32 %v510_v44, %v421_v43 }
  0xaa   :  { %v692_v47 = vadd.f32 %v1650_v41, %v511_v46 }
  0xac   :  { %v724_v53 = vmax.f32 %v692_v47, 0.0  ;;  %v1668_v54 = vpop.f32.mrf.mxu3 }
  0xae   :  { %v424_v56 = vpop.f32.mrf.mxu0  ;;  %v755_v57 = vpack.c.bf16 %v724_v53, %v723_v52 }
  0xaf   :  { %v513_v59 = vpop.f32.mrf.mxu1 }
  0xb0   :  { %843 = vmatmul.bf16.vlgmr.msra.gmra.mxu2 %v755_v57  ;;  %v514_v60 = vadd.f32 %v513_v59, %v424_v56 }
  0xb1   :  { %463 = vmatmul.bf16.gmra.mxu0 %v1069_v55 }
  0xb2   :  { %552 = vmatmul.bf16.gmra.mxu1 %v1073_v58  ;;  %v693_v0 = vadd.f32 %v1650_v41, %v514_v60 }
  0xb4   :  { %v1670_v61 = vpop.f32.mrf.mxu3  ;;  %v725_v7 = vmax.f32 %v693_v0, 0.0 }
  0xb6   :  { %v426_v62 = vpop.f32.mrf.mxu0 }
  0xb7   :  { %v515_v63 = vpop.f32.mrf.mxu1 }
  0xb8   :  { %v516_v1 = vadd.f32 %v515_v63, %v426_v62 }
  0xba   :  { %v694_v2 = vadd.f32 %v1650_v41, %v516_v1 }
  0xbc   :  { %v726_v8 = vmax.f32 %v694_v2, 0.0  ;;  %v1686_v9 = vpop.f32.mrf.mxu3 }
  0xbe   :  { %v429_v11 = vpop.f32.mrf.mxu0  ;;  %v756_v12 = vpack.c.bf16 %v726_v8, %v725_v7 }
  0xbf   :  { %v518_v14 = vpop.f32.mrf.mxu1 }
  0xc0   :  { %848 = vmatmul.bf16.gmra.mxu2 %v756_v12  ;;  %v519_v15 = vadd.f32 %v518_v14, %v429_v11 }
  0xc1   :  { %468 = vmatmul.bf16.gmra.mxu0 %v1077_v10 }
  0xc2   :  { %557 = vmatmul.bf16.gmra.mxu1 %v1081_v13  ;;  %v695_v19 = vadd.f32 %v1650_v41, %v519_v15 }
  0xc4   :  { %v1688_v16 = vpop.f32.mrf.mxu3  ;;  %v727_v26 = vmax.f32 %v695_v19, 0.0 }
  0xc6   :  { %v431_v17 = vpop.f32.mrf.mxu0 }
  0xc7   :  { %v520_v18 = vpop.f32.mrf.mxu1 }
  0xc8   :  { %v521_v20 = vadd.f32 %v520_v18, %v431_v17 }
  0xca   :  { %v696_v21 = vadd.f32 %v1650_v41, %v521_v20 }
  0xcc   :  { %v728_v27 = vmax.f32 %v696_v21, 0.0  ;;  %v1704_v28 = vpop.f32.mrf.mxu3 }
  0xce   :  { %v434_v30 = vpop.f32.mrf.mxu0  ;;  %v757_v31 = vpack.c.bf16 %v728_v27, %v727_v26 }
  0xcf   :  { %v523_v33 = vpop.f32.mrf.mxu1 }
  0xd0   :  { %853 = vmatmul.bf16.gmra.mxu2 %v757_v31  ;;  %v524_v34 = vadd.f32 %v523_v33, %v434_v30 }
  0xd1   :  { %473 = vmatmul.bf16.gmra.mxu0 %v1085_v29 }
  0xd2   :  { %562 = vmatmul.bf16.gmra.mxu1 %v1089_v32  ;;  %v697_v38 = vadd.f32 %v1650_v41, %v524_v34 }
  0xd4   :  { %v1706_v35 = vpop.f32.mrf.mxu3  ;;  %v729_v43 = vmax.f32 %v697_v38, 0.0 }
  0xd6   :  { %v436_v36 = vpop.f32.mrf.mxu0 }
  0xd7   :  { %v525_v37 = vpop.f32.mrf.mxu1 }
  0xd8   :  { %v526_v39 = vadd.f32 %v525_v37, %v436_v36 }
  0xda   :  { %v698_v40 = vadd.f32 %v1650_v41, %v526_v39 }
  0xdc   :  { %v730_v44 = vmax.f32 %v698_v40, 0.0  ;;  %v1710_v45 = vpop.f32.mrf.mxu3 }
  0xde   :  { %v439_v46 = vpop.f32.mrf.mxu0  ;;  %v758_v47 = vpack.c.bf16 %v730_v44, %v729_v43 }
  0xdf   :  { %v528_v48 = vpop.f32.mrf.mxu1 }
  0xe0   :  { %858 = vmatmul.bf16.gmra.mxu2 %v758_v47  ;;  %v529_v49 = vadd.f32 %v528_v48, %v439_v46 }
  0xe2   :  { %v699_v53 = vadd.f32 %v1650_v41, %v529_v49 }
  0xe4   :  { %v568_v50 = vpop.f32.mrf.mxu3  ;;  %v731_v58 = vmax.f32 %v699_v53, 0.0 }
  0xe5   :  { %v569_v56 = vadd.f32 %v568_v50, %v1652_v42 }
  0xe6   :  { %v441_v51 = vpop.f32.mrf.mxu0 }
  0xe7   :  { %v530_v52 = vpop.f32.mrf.mxu1  ;;  %v715_v62 = vadd.f32 %v1650_v41, %v569_v56 }
  0xe8   :  { %v531_v55 = vadd.f32 %v530_v52, %v441_v51 }
  0xe9   :  { %v747_v4 = vmax.f32 %v715_v62, 0.0 }
  0xea   :  { %v700_v57 = vadd.f32 %v1650_v41, %v531_v55 }
  0xec   :  { %v732_v59 = vmax.f32 %v700_v57, 0.0  ;;  %v570_v60 = vpop.f32.mrf.mxu3 }
  0xed   :  { %v571_v63 = vadd.f32 %v570_v60, %v1668_v54 }
  0xee   :  { %v444_v0 = vpop.f32.mrf.mxu0  ;;  %v759_v1 = vpack.c.bf16 %v732_v59, %v731_v58 }
  0xef   :  { %v716_v2 = vadd.f32 %v1650_v41, %v571_v63  ;;  %v533_v3 = vpop.f32.mrf.mxu1 }
  0xf0   :  { %863 = vmatmul.bf16.gmra.mxu2 %v759_v1  ;;  %v534_v7 = vadd.f32 %v533_v3, %v444_v0 }
  0xf1   :  { %v748_v5 = vmax.f32 %v716_v2, 0.0 }
  0xf2   :  { %v701_v11 = vadd.f32 %v1650_v41, %v534_v7 }
  0xf3   :  { %v767_v6 = vpack.c.bf16 %v748_v5, %v747_v4 }
  0xf4   :  { %v573_v42 = vpop.f32.mrf.mxu3  ;;  %v733_v14 = vmax.f32 %v701_v11, 0.0 }
  0xf5   :  { %903 = vmatmul.bf16.vlgmr.msra.gmra.mxu3 %v767_v6  ;;  %v574_v13 = vadd.f32 %v573_v42, %v1670_v61 }
  0xf6   :  { %v446_v8 = vpop.f32.mrf.mxu0 }
  0xf7   :  { %v535_v10 = vpop.f32.mrf.mxu1  ;;  %v717_v18 = vadd.f32 %v1650_v41, %v574_v13 }
  0xf8   :  { %v536_v12 = vadd.f32 %v535_v10, %v446_v8 }
  0xf9   :  { %v749_v24 = vmax.f32 %v717_v18, 0.0 }
  0xfa   :  { %v702_v54 = vadd.f32 %v1650_v41, %v536_v12 }
  0xfc   :  { %v734_v15 = vmax.f32 %v702_v54, 0.0  ;;  %v575_v17 = vpop.f32.mrf.mxu3 }
  0xfd   :  { %v576_v19 = vadd.f32 %v575_v17, %v1686_v9 }
  0xfe   :  { %v449_v20 = vpop.f32.mrf.mxu0  ;;  %v760_v21 = vpack.c.bf16 %v734_v15, %v733_v14 }
  0xff   :  { %v718_v22 = vadd.f32 %v1650_v41, %v576_v19  ;;  %v538_v23 = vpop.f32.mrf.mxu1 }
 0x100   :  { %868 = vmatmul.bf16.gmra.mxu2 %v760_v21  ;;  %v539_v27 = vadd.f32 %v538_v23, %v449_v20 }
 0x101   :  { %v750_v25 = vmax.f32 %v718_v22, 0.0 }
 0x102   :  { %v703_v31 = vadd.f32 %v1650_v41, %v539_v27 }
 0x103   :  { %v768_v26 = vpack.c.bf16 %v750_v25, %v749_v24 }
 0x104   :  { %v578_v61 = vpop.f32.mrf.mxu3  ;;  %v735_v34 = vmax.f32 %v703_v31, 0.0 }
 0x105   :  { %908 = vmatmul.bf16.gmra.mxu3 %v768_v26  ;;  %v579_v33 = vadd.f32 %v578_v61, %v1688_v16 }
 0x106   :  { %v451_v29 = vpop.f32.mrf.mxu0 }
 0x107   :  { %v540_v30 = vpop.f32.mrf.mxu1  ;;  %v719_v38 = vadd.f32 %v1650_v41, %v579_v33 }
 0x108   :  { %v541_v32 = vadd.f32 %v540_v30, %v451_v29 }
 0x109   :  { %v751_v47 = vmax.f32 %v719_v38, 0.0 }
 0x10a   :  { %v704_v9 = vadd.f32 %v1650_v41, %v541_v32 }
 0x10c   :  { %v736_v36 = vmax.f32 %v704_v9, 0.0  ;;  %v580_v37 = vpop.f32.mrf.mxu3 }
 0x10d   :  { %v581_v39 = vadd.f32 %v580_v37, %v1704_v28 }
 0x10e   :  { %v454_v40 = vpop.f32.mrf.mxu0  ;;  %v761_v43 = vpack.c.bf16 %v736_v36, %v735_v34 }
 0x10f   :  { %v720_v44 = vadd.f32 %v1650_v41, %v581_v39  ;;  %v543_v46 = vpop.f32.mrf.mxu1 }
 0x110   :  { %873 = vmatmul.bf16.gmra.mxu2 %v761_v43  ;;  %v544_v50 = vadd.f32 %v543_v46, %v454_v40 }
 0x111   :  { %v752_v48 = vmax.f32 %v720_v44, 0.0 }
 0x112   :  { %v705_v53 = vadd.f32 %v1650_v41, %v544_v50 }
 0x113   :  { %v769_v49 = vpack.c.bf16 %v752_v48, %v751_v47 }
 0x114   :  { %v583_v16 = vpop.f32.mrf.mxu3  ;;  %v737_v57 = vmax.f32 %v705_v53, 0.0 }
 0x115   :  { %913 = vmatmul.bf16.gmra.mxu3 %v769_v49  ;;  %v584_v56 = vadd.f32 %v583_v16, %v1706_v35 }
 0x116   :  { %v456_v51 = vpop.f32.mrf.mxu0 }
 0x117   :  { %v545_v52 = vpop.f32.mrf.mxu1  ;;  %v721_v60 = vadd.f32 %v1650_v41, %v584_v56 }
 0x118   :  { %v546_v55 = vadd.f32 %v545_v52, %v456_v51 }
 0x119   :  { %v753_v3 = vmax.f32 %v721_v60, 0.0 }
 0x11a   :  { %v706_v28 = vadd.f32 %v1650_v41, %v546_v55 }
 0x11c   :  { %v738_v58 = vmax.f32 %v706_v28, 0.0  ;;  %v585_v59 = vpop.f32.mrf.mxu3 }
 0x11d   :  { %v586_v62 = vadd.f32 %v585_v59, %v1710_v45 }
 0x11e   :  { %v459_v63 = vpop.f32.mrf.mxu0  ;;  %v762_v0 = vpack.c.bf16 %v738_v58, %v737_v57 }
 0x11f   :  { %v722_v1 = vadd.f32 %v1650_v41, %v586_v62  ;;  %v548_v2 = vpop.f32.mrf.mxu1 }
 0x120   :  { %878 = vmatmul.bf16.gmra.mxu2 %v762_v0  ;;  %v549_v6 = vadd.f32 %v548_v2, %v459_v63 }
 0x121   :  { %v754_v4 = vmax.f32 %v722_v1, 0.0 }
 0x122   :  { %v707_v42 = vadd.f32 %v1650_v41, %v549_v6 }
 0x123   :  { %v770_v5 = vpack.c.bf16 %v754_v4, %v753_v3 }
 0x124   :  { %v739_v11 = vmax.f32 %v707_v42, 0.0 }
 0x125   :  { %918 = vmatmul.bf16.gmra.mxu3 %v770_v5 }
 0x126   :  { %v461_v35 = vpop.f32.mrf.mxu0 }
 0x127   :  { %v550_v7 = vpop.f32.mrf.mxu1 }
 0x128   :  { %v551_v8 = vadd.f32 %v550_v7, %v461_v35 }
 0x12a   :  { %v708_v10 = vadd.f32 %v1650_v41, %v551_v8 }
 0x12c   :  { %v740_v45 = vmax.f32 %v708_v10, 0.0 }
 0x12e   :  { %v464_v12 = vpop.f32.mrf.mxu0  ;;  %v763_v13 = vpack.c.bf16 %v740_v45, %v739_v11 }
 0x12f   :  { %v553_v54 = vpop.f32.mrf.mxu1 }
 0x130   :  { %883 = vmatmul.bf16.gmra.mxu2 %v763_v13  ;;  %v554_v15 = vadd.f32 %v553_v54, %v464_v12 }
 0x132   :  { %v709_v19 = vadd.f32 %v1650_v41, %v554_v15 }
 0x133   :  { %v844_v14 = vpop.f32.mrf.mxu2 }
 0x134   :  { %v741_v23 = vmax.f32 %v709_v19, 0.0 }
 0x136   :  { %v466_v17 = vpop.f32.mrf.mxu0 }
 0x137   :  { %v555_v18 = vpop.f32.mrf.mxu1 }
 0x138   :  { %v556_v20 = vadd.f32 %v555_v18, %v466_v17 }
 0x13a   :  { %v710_v21 = vadd.f32 %v1650_v41, %v556_v20 }
 0x13b   :  { %v846_v22 = vpop.f32.mrf.mxu2 }
 0x13c   :  { %v742_v24 = vmax.f32 %v710_v21, 0.0  ;;  %v1277_v25 = vpack.c.bf16 %v846_v22, %v844_v14 }
 0x13e   :  { %1278 = vst [vmem:[%s1796_s4] sm:$0xff] %v1277_v25   ;;  %v469_v26 = vpop.f32.mrf.mxu0  ;;  %v764_v27 = vpack.c.bf16 %v742_v24, %v741_v23 }
 0x13f   :  { %v558_v61 = vpop.f32.mrf.mxu1 }
 0x140   :  { %888 = vmatmul.bf16.gmra.mxu2 %v764_v27  ;;  %v559_v30 = vadd.f32 %v558_v61, %v469_v26 }
 0x142   :  { %v711_v33 = vadd.f32 %v1650_v41, %v559_v30 }
 0x143   :  { %v849_v29 = vpop.f32.mrf.mxu2 }
 0x144   :  { %v743_v37 = vmax.f32 %v711_v33, 0.0 }
 0x146   :  { %v471_v31 = vpop.f32.mrf.mxu0 }
 0x147   :  { %v560_v32 = vpop.f32.mrf.mxu1 }
 0x148   :  { %v561_v9 = vadd.f32 %v560_v32, %v471_v31 }
 0x14a   :  { %v712_v34 = vadd.f32 %v1650_v41, %v561_v9 }
 0x14b   :  { %v851_v36 = vpop.f32.mrf.mxu2 }
 0x14c   :  { %v744_v38 = vmax.f32 %v712_v34, 0.0  ;;  %v1282_v39 = vpack.c.bf16 %v851_v36, %v849_v29 }
 0x14e   :  { %1354 = vst [vmem:[%s1796_s4 + $0x8] sm:$0xff] %v1282_v39   ;;  %v474_v40 = vpop.f32.mrf.mxu0  ;;  %v765_v43 = vpack.c.bf16 %v744_v38, %v743_v37 }
 0x14f   :  { %v563_v44 = vpop.f32.mrf.mxu1 }
 0x150   :  { %893 = vmatmul.bf16.gmra.mxu2 %v765_v43  ;;  %v564_v47 = vadd.f32 %v563_v44, %v474_v40 }
 0x152   :  { %v713_v50 = vadd.f32 %v1650_v41, %v564_v47 }
 0x153   :  { %v854_v46 = vpop.f32.mrf.mxu2 }
 0x154   :  { %v745_v53 = vmax.f32 %v713_v50, 0.0 }
 0x156   :  { %v476_v48 = vpop.f32.mrf.mxu0 }
 0x157   :  { %v565_v49 = vpop.f32.mrf.mxu1 }
 0x158   :  { %v566_v16 = vadd.f32 %v565_v49, %v476_v48 }
 0x15a   :  { %v714_v51 = vadd.f32 %v1650_v41, %v566_v16 }
 0x15b   :  { %v856_v52 = vpop.f32.mrf.mxu2 }
 0x15c   :  { %v746_v55 = vmax.f32 %v714_v51, 0.0  ;;  %v1287_v56 = vpack.c.bf16 %v856_v52, %v854_v46 }
 0x15e   :  { %1355 = vst [vmem:[%s1796_s4 + $0x10] sm:$0xff] %v1287_v56   ;;  %v766_v28 = vpack.c.bf16 %v746_v55, %v745_v53 }
 0x160   :  { %898 = vmatmul.bf16.gmra.mxu2 %v766_v28 }
 0x163   :  { %v859_v57 = vpop.f32.mrf.mxu2 }
 0x16b   :  { %v861_v58 = vpop.f32.mrf.mxu2 }
 0x16c   :  { %v1292_v59 = vpack.c.bf16 %v861_v58, %v859_v57 }
 0x16e   :  { %1356 = vst [vmem:[%s1796_s4 + $0x18] sm:$0xff] %v1292_v59  }
 0x173   :  { %v864_v60 = vpop.f32.mrf.mxu2 }
 0x178   :  { %v904_v62 = vpop.f32.mrf.mxu3 }
 0x17b   :  { %v866_v41 = vpop.f32.mrf.mxu2 }
 0x17c   :  { %v1297_v63 = vpack.c.bf16 %v866_v41, %v864_v60 }
 0x17e   :  { %1357 = vst [vmem:[%s1796_s4 + $0x20] sm:$0xff] %v1297_v63  }
 0x180   :  { %v906_v0 = vpop.f32.mrf.mxu3 }
 0x181   :  { %v1337_v1 = vpack.c.bf16 %v906_v0, %v904_v62 }
 0x183   :  { %1365 = vst [vmem:[%s1796_s4 + $0x60] sm:$0xff] %v1337_v1   ;;  %v869_v2 = vpop.f32.mrf.mxu2 }
 0x188   :  { %v909_v3 = vpop.f32.mrf.mxu3 }
 0x18b   :  { %v871_v4 = vpop.f32.mrf.mxu2 }
 0x18c   :  { %v1302_v5 = vpack.c.bf16 %v871_v4, %v869_v2 }
 0x18e   :  { %1358 = vst [vmem:[%s1796_s4 + $0x28] sm:$0xff] %v1302_v5  }
 0x190   :  { %v911_v6 = vpop.f32.mrf.mxu3 }
 0x191   :  { %v1342_v35 = vpack.c.bf16 %v911_v6, %v909_v3 }
 0x193   :  { %1366 = vst [vmem:[%s1796_s4 + $0x68] sm:$0xff] %v1342_v35   ;;  %v874_v7 = vpop.f32.mrf.mxu2 }
 0x198   :  { %v914_v42 = vpop.f32.mrf.mxu3 }
 0x19b   :  { %v876_v8 = vpop.f32.mrf.mxu2 }
 0x19c   :  { %v1307_v10 = vpack.c.bf16 %v876_v8, %v874_v7 }
 0x19e   :  { %1359 = vst [vmem:[%s1796_s4 + $0x30] sm:$0xff] %v1307_v10  }
 0x1a0   :  { %v916_v11 = vpop.f32.mrf.mxu3 }
 0x1a1   :  { %v1347_v45 = vpack.c.bf16 %v916_v11, %v914_v42 }
 0x1a3   :  { %1367 = vst [vmem:[%s1796_s4 + $0x70] sm:$0xff] %v1347_v45   ;;  %v879_v12 = vpop.f32.mrf.mxu2 }
 0x1a8   :  { %v919_v13 = vpop.f32.mrf.mxu3 }
 0x1ab   :  { %v881_v54 = vpop.f32.mrf.mxu2 }
 0x1ac   :  { %v1312_v14 = vpack.c.bf16 %v881_v54, %v879_v12 }
 0x1ae   :  { %1360 = vst [vmem:[%s1796_s4 + $0x38] sm:$0xff] %v1312_v14  }
 0x1b0   :  { %v921_v15 = vpop.f32.mrf.mxu3 }
 0x1b1   :  { %v1352_v17 = vpack.c.bf16 %v921_v15, %v919_v13 }
 0x1b3   :  { %1368 = vst [vmem:[%s1796_s4 + $0x78] sm:$0xff] %v1352_v17   ;;  %v884_v18 = vpop.f32.mrf.mxu2 }
 0x1bb   :  { %v886_v19 = vpop.f32.mrf.mxu2 }
 0x1bc   :  { %v1317_v20 = vpack.c.bf16 %v886_v19, %v884_v18 }
 0x1be   :  { %1361 = vst [vmem:[%s1796_s4 + $0x40] sm:$0xff] %v1317_v20  }
 0x1c3   :  { %v889_v21 = vpop.f32.mrf.mxu2 }
 0x1cb   :  { %v891_v22 = vpop.f32.mrf.mxu2 }
 0x1cc   :  { %v1322_v23 = vpack.c.bf16 %v891_v22, %v889_v21 }
 0x1ce   :  { %1362 = vst [vmem:[%s1796_s4 + $0x48] sm:$0xff] %v1322_v23  }
 0x1d3   :  { %v894_v24 = vpop.f32.mrf.mxu2 }
 0x1db   :  { %v896_v25 = vpop.f32.mrf.mxu2 }
 0x1dc   :  { %v1327_v26 = vpack.c.bf16 %v896_v25, %v894_v24 }
 0x1de   :  { %1363 = vst [vmem:[%s1796_s4 + $0x50] sm:$0xff] %v1327_v26  }
 0x1e3   :  { %v899_v27 = vpop.f32.mrf.mxu2 }
 0x1eb   :  { %v901_v61 = vpop.f32.mrf.mxu2 }
 0x1ec   :  { %v1332_v29 = vpack.c.bf16 %v901_v61, %v899_v27 }
 0x1ee   :  { %1364 = vst [vmem:[%s1796_s4 + $0x58] sm:$0xff] %v1332_v29  }

</bundles_post_ra>
